<compile_context>
chip_gen: v7x
topology: tpu7x:2x2x1
jax: 0.10.0
libtpu: 0.0.40
codegen_flags: <defaults>
</compile_context>

<pallas_src>
import functools

import jax
import jax.numpy as jnp
from jax import lax
from jax.experimental import pallas as pl
from jax.experimental.pallas import tpu as pltpu


def lstm_kernel(x_ref, wx_ref, wh_ref, b_ref, wfc_ref, bfc_ref, out_ref,
                *, seq_len, hidden_pad):
    """One batch block: full LSTM recurrence + final FC + sigmoid."""
    Hp = hidden_pad
    b_blk = out_ref.shape[0]

    # Loop-invariant operands, hoisted out of the recurrence (JAX does not CSE
    # broadcast_in_dim, so materialize the bias broadcast exactly once).
    wx = wx_ref[...]                                          # (E,  4Hp) bf16
    wh = wh_ref[...]                                          # (Hp, 4Hp) bf16
    bias = jnp.broadcast_to(b_ref[...], (b_blk, 4 * Hp))      # (B_blk, 4Hp) f32
    wfc = wfc_ref[...]                                        # (1, Hp) f32
    bfc = bfc_ref[...]                                        # (1, 1)  f32

    def step(t, carry):
        h_prev, c_prev = carry                                # f32 (B_blk, Hp)
        x_t = x_ref[t]                                        # (B_blk, E) bf16
        gates = (jnp.dot(x_t, wx, preferred_element_type=jnp.float32)
                 + jnp.dot(h_prev.astype(jnp.bfloat16), wh,
                           preferred_element_type=jnp.float32)
                 + bias)                                      # (B_blk, 4Hp) f32
        # Each gate occupies its own 128-lane-aligned block of Hp lanes.
        f_g = jax.nn.sigmoid(gates[:, 0 * Hp:1 * Hp])
        i_g = jax.nn.sigmoid(gates[:, 1 * Hp:2 * Hp])
        c_g = jnp.tanh(gates[:, 2 * Hp:3 * Hp])
        o_g = jax.nn.sigmoid(gates[:, 3 * Hp:4 * Hp])
        c_t = f_g * c_prev + i_g * c_g
        h_t = o_g * jnp.tanh(c_t)
        return h_t, c_t

    h0 = jnp.zeros((b_blk, Hp), jnp.float32)
    c0 = jnp.zeros((b_blk, Hp), jnp.float32)
    h_last, _ = lax.fori_loop(0, seq_len, step, (h0, c0), unroll=True)

    # output_size == 1: VPU multiply + lane reduction instead of a 1-wide MXU matmul.
    logit = jnp.sum(h_last * wfc, axis=-1, keepdims=True) + bfc   # (B_blk, 1)
    out_ref[...] = jax.nn.sigmoid(logit)


def sentiment_lstm_forward(token_ids, embedding_matrix, w, b, w_fc, b_fc,
                           hidden_size, *, batch_block=None):
    """token_ids: (B, T) int32.  Returns (B,) float32 probabilities."""
    B, T = token_ids.shape
    E = embedding_matrix.shape[1]
    H = hidden_size
    Hp = ((H + 127) // 128) * 128            # 128-lane-aligned per-gate width

    # Embedding gather straight into time-major (T, B, E) layout; bf16 operands
    # for the MXU (halves the kernel's x DMA bytes).  No (B,T,E)->(T,B,E) HBM
    # transpose of the big embedded tensor.
    x_tbe = jnp.take(embedding_matrix, token_ids.T, axis=0).astype(jnp.bfloat16)

    # Split the fused (4H, E+H) weight into Wx / Wh, transpose for row-major
    # matmuls, and pad gate columns so gate k lives at columns [k*Hp, k*Hp + H).
    w_x_t = w[:, :E].T                        # (E, 4H)
    w_h_t = w[:, E:].T                        # (H, 4H)

    def pad_gates(mat_t, rows_pad):
        rows = mat_t.shape[0]
        out = jnp.zeros((rows_pad, 4 * Hp), jnp.float32)
        for k in range(4):
            out = out.at[:rows, k * Hp:k * Hp + H].set(mat_t[:, k * H:(k + 1) * H])
        return out

    wx_t = pad_gates(w_x_t, E).astype(jnp.bfloat16)           # (E, 4Hp)  bf16
    wh_t = pad_gates(w_h_t, Hp).astype(jnp.bfloat16)          # (Hp, 4Hp) bf16
    b_pad = pad_gates(b.reshape(1, 4 * H), 1)                 # (1, 4Hp)  f32
    wfc_pad = jnp.zeros((1, Hp), jnp.float32).at[:, :H].set(w_fc.reshape(1, H))
    bfc2 = b_fc.reshape(1, 1).astype(jnp.float32)

    if batch_block is None:
        batch_block = B          # demo: one block; shrink to split batch across v7x cores
    assert B % batch_block == 0
    n_b = B // batch_block

    out = pl.pallas_call(
        functools.partial(lstm_kernel, seq_len=T, hidden_pad=Hp),
        out_shape=jax.ShapeDtypeStruct((B, 1), jnp.float32),
        grid_spec=pltpu.PrefetchScalarGridSpec(
            num_scalar_prefetch=0,
            grid=(n_b,),
            in_specs=[
                pl.BlockSpec((T, batch_block, E), lambda bb: (0, bb, 0)),  # x slab
                pl.BlockSpec((E, 4 * Hp), lambda bb: (0, 0)),              # Wx^T
                pl.BlockSpec((Hp, 4 * Hp), lambda bb: (0, 0)),             # Wh^T
                pl.BlockSpec((1, 4 * Hp), lambda bb: (0, 0)),              # bias
                pl.BlockSpec((1, Hp), lambda bb: (0, 0)),                  # fc weight row
                pl.BlockSpec((1, 1), lambda bb: (0, 0)),                   # fc bias
            ],
            out_specs=pl.BlockSpec((batch_block, 1), lambda bb: (bb, 0)),
        ),
        compiler_params=pltpu.CompilerParams(
            dimension_semantics=("parallel",)),   # batch blocks are independent (v7x megacore)
    )(x_tbe, wx_t, wh_t, b_pad, wfc_pad, bfc2)

    return out[:, 0]                                          # squeeze(1)


def reference_forward(token_ids, embedding_matrix, w, b, w_fc, b_fc, hidden_size):
    """Pure-JAX f32 reference mirroring the PyTorch module."""
    embedded = embedding_matrix[token_ids]               # (B, T, E)
    B, T, E = embedded.shape
    h = jnp.zeros((B, hidden_size), jnp.float32)
    c = jnp.zeros((B, hidden_size), jnp.float32)
    for t in range(T):
        x_t = embedded[:, t, :]
        combined = jnp.concatenate([x_t, h], axis=1)
        gates = combined @ w.T + b
        f_g, i_g, c_g, o_g = jnp.split(gates, 4, axis=1)
        f_g = jax.nn.sigmoid(f_g)
        i_g = jax.nn.sigmoid(i_g)
        c_g = jnp.tanh(c_g)
        o_g = jax.nn.sigmoid(o_g)
        c = f_g * c + i_g * c_g
        h = o_g * jnp.tanh(c)
    out = jax.nn.sigmoid(h @ w_fc.T + b_fc)
    return out[:, 0]


if __name__ == "__main__":
    # Small, forward-consistent shapes (production: E=300, H=128, B=32).
    VOCAB = 64          # embedding vocabulary size
    E = 32              # input_size (embedding dim)
    H = 32              # hidden_size
    B = 8               # batch
    T = 8               # sequence length
    OUT = 1             # output_size

    key = jax.random.PRNGKey(0)
    k_emb, k_w, k_b, k_wfc, k_bfc, k_x = jax.random.split(key, 6)

    # Deterministic synthetic parameters (no checkpoint load).
    embedding_matrix = jax.random.normal(k_emb, (VOCAB, E), jnp.float32) * 0.1
    w = jax.random.normal(k_w, (4 * H, E + H), jnp.float32) * 0.1     # nn.Linear(E+H, 4H)
    b = jax.random.normal(k_b, (4 * H,), jnp.float32) * 0.1
    w_fc = jax.random.normal(k_wfc, (OUT, H), jnp.float32) * 0.1      # nn.Linear(H, 1)
    b_fc = jax.random.normal(k_bfc, (OUT,), jnp.float32) * 0.1

    token_ids = jax.random.randint(k_x, (B, T), 0, VOCAB, jnp.int32)

    out = sentiment_lstm_forward(token_ids, embedding_matrix, w, b, w_fc, b_fc, H)
    out = jax.block_until_ready(out)

    ref = reference_forward(token_ids, embedding_matrix, w, b, w_fc, b_fc, H)
    assert out.shape == (B,)
    # bf16 MXU operands vs. an f32 reference -> modest tolerance.
    assert jnp.allclose(out, ref, atol=1e-2, rtol=1e-2), (out, ref)

    print("KERNEL_OK")
</pallas_src>

<mosaic_0001>
module attributes {stable_mosaic.version = 11 : i64} {
  func.func @lstm_kernel(%arg0: i32, %arg1: memref<8x8x32xbf16, #tpu.memory_space<vmem>>, %arg2: memref<32x512xbf16, #tpu.memory_space<vmem>>, %arg3: memref<128x512xbf16, #tpu.memory_space<vmem>>, %arg4: memref<1x512xf32, #tpu.memory_space<vmem>>, %arg5: memref<1x128xf32, #tpu.memory_space<vmem>>, %arg6: memref<1x1xf32, #tpu.memory_space<vmem>>, %arg7: memref<8x1xf32, #tpu.memory_space<vmem>>) attributes {dimension_semantics = [#tpu.dimension_semantics<parallel>], iteration_bounds = array<i64: 1>, scalar_prefetch = 0 : i64, scratch_operands = 0 : i64, tpu.core_type = #tpu.core_type<tc>, window_params = [{transform_indices = @transform_0, window_bounds = array<i64: 8, 8, 32>}, {pipeline_mode = #tpu.pipeline_mode<synchronous>, transform_indices = @transform_1, window_bounds = array<i64: 32, 512>}, {pipeline_mode = #tpu.pipeline_mode<synchronous>, transform_indices = @transform_2, window_bounds = array<i64: 128, 512>}, {pipeline_mode = #tpu.pipeline_mode<synchronous>, transform_indices = @transform_3, window_bounds = array<i64: 1, 512>}, {pipeline_mode = #tpu.pipeline_mode<synchronous>, transform_indices = @transform_4, window_bounds = array<i64: 1, 128>}, {pipeline_mode = #tpu.pipeline_mode<synchronous>, transform_indices = @transform_5, window_bounds = array<i64: 1, 1>}, {transform_indices = @transform_6, window_bounds = array<i64: 8, 1>}]} {
    %c0 = arith.constant 0 : index
    %c0_0 = arith.constant 0 : index
    %0 = vector.load %arg2[%c0, %c0_0] : memref<32x512xbf16, #tpu.memory_space<vmem>>, vector<32x512xbf16>
    %c0_1 = arith.constant 0 : index
    %c0_2 = arith.constant 0 : index
    %1 = vector.load %arg3[%c0_1, %c0_2] : memref<128x512xbf16, #tpu.memory_space<vmem>>, vector<128x512xbf16>
    %c0_3 = arith.constant 0 : index
    %c0_4 = arith.constant 0 : index
    %2 = vector.load %arg4[%c0_3, %c0_4] : memref<1x512xf32, #tpu.memory_space<vmem>>, vector<1x512xf32>
    %3 = vector.shape_cast %2 : vector<1x512xf32> to vector<1x512xf32>
    %4 = vector.broadcast %3 : vector<1x512xf32> to vector<8x512xf32>
    %c0_5 = arith.constant 0 : index
    %c0_6 = arith.constant 0 : index
    %5 = vector.load %arg5[%c0_5, %c0_6] : memref<1x128xf32, #tpu.memory_space<vmem>>, vector<1x128xf32>
    %c0_7 = arith.constant 0 : index
    %c0_8 = arith.constant 0 : index
    %6 = vector.load %arg6[%c0_7, %c0_8] : memref<1x1xf32, #tpu.memory_space<vmem>>, vector<1x1xf32>
    %cst = arith.constant 0.000000e+00 : f32
    %7 = vector.broadcast %cst : f32 to vector<8x128xf32>
    %cst_9 = arith.constant 0.000000e+00 : f32
    %8 = vector.broadcast %cst_9 : f32 to vector<8x128xf32>
    %c0_i32 = arith.constant 0 : i32
    %9 = arith.index_cast %c0_i32 : i32 to index
    %c0_10 = arith.constant 0 : index
    %c0_11 = arith.constant 0 : index
    %10 = vector.load %arg1[%9, %c0_10, %c0_11] : memref<8x8x32xbf16, #tpu.memory_space<vmem>>, vector<1x8x32xbf16>
    %11 = vector.shape_cast %10 : vector<1x8x32xbf16> to vector<8x32xbf16>
    %cst_12 = arith.constant dense<0.000000e+00> : vector<8x512xf32>
    %12 = tpu.matmul %11, %0, %cst_12 {dimension_numbers = #tpu.dot_dimension_numbers<[1], [0], [0], [1], [0, 0, 1, 1], [], []>} : vector<8x32xbf16>, vector<32x512xbf16>, vector<8x512xf32> -> vector<8x512xf32>
    %13 = arith.truncf %7 : vector<8x128xf32> to vector<8x128xbf16>
    %cst_13 = arith.constant dense<0.000000e+00> : vector<8x512xf32>
    %14 = tpu.matmul %13, %1, %cst_13 {dimension_numbers = #tpu.dot_dimension_numbers<[1], [0], [0], [1], [0, 0, 1, 1], [], []>} : vector<8x128xbf16>, vector<128x512xbf16>, vector<8x512xf32> -> vector<8x512xf32>
    %15 = arith.addf %12, %14 : vector<8x512xf32>
    %16 = arith.addf %15, %4 : vector<8x512xf32>
    %17 = vector.extract_strided_slice %16 {offsets = [0, 0], sizes = [8, 128], strides = [1, 1]} : vector<8x512xf32> to vector<8x128xf32>
    %18 = arith.negf %17 : vector<8x128xf32>
    %19 = math.exp %18 : vector<8x128xf32>
    %cst_14 = arith.constant 1.000000e+00 : f32
    %20 = vector.broadcast %cst_14 : f32 to vector<8x128xf32>
    %21 = arith.addf %20, %19 : vector<8x128xf32>
    %22 = arith.divf %20, %21 : vector<8x128xf32>
    %23 = vector.extract_strided_slice %16 {offsets = [0, 128], sizes = [8, 128], strides = [1, 1]} : vector<8x512xf32> to vector<8x128xf32>
    %24 = arith.negf %23 : vector<8x128xf32>
    %25 = math.exp %24 : vector<8x128xf32>
    %cst_15 = arith.constant 1.000000e+00 : f32
    %26 = vector.broadcast %cst_15 : f32 to vector<8x128xf32>
    %27 = arith.addf %26, %25 : vector<8x128xf32>
    %28 = arith.divf %26, %27 : vector<8x128xf32>
    %29 = vector.extract_strided_slice %16 {offsets = [0, 256], sizes = [8, 128], strides = [1, 1]} : vector<8x512xf32> to vector<8x128xf32>
    %30 = math.tanh %29 : vector<8x128xf32>
    %31 = vector.extract_strided_slice %16 {offsets = [0, 384], sizes = [8, 128], strides = [1, 1]} : vector<8x512xf32> to vector<8x128xf32>
    %32 = arith.negf %31 : vector<8x128xf32>
    %33 = math.exp %32 : vector<8x128xf32>
    %cst_16 = arith.constant 1.000000e+00 : f32
    %34 = vector.broadcast %cst_16 : f32 to vector<8x128xf32>
    %35 = arith.addf %34, %33 : vector<8x128xf32>
    %36 = arith.divf %34, %35 : vector<8x128xf32>
    %37 = arith.mulf %22, %8 : vector<8x128xf32>
    %38 = arith.mulf %28, %30 : vector<8x128xf32>
    %39 = arith.addf %37, %38 : vector<8x128xf32>
    %40 = math.tanh %39 : vector<8x128xf32>
    %41 = arith.mulf %36, %40 : vector<8x128xf32>
    %c1_i32 = arith.constant 1 : i32
    %42 = arith.index_cast %c1_i32 : i32 to index
    %c0_17 = arith.constant 0 : index
    %c0_18 = arith.constant 0 : index
    %43 = vector.load %arg1[%42, %c0_17, %c0_18] : memref<8x8x32xbf16, #tpu.memory_space<vmem>>, vector<1x8x32xbf16>
    %44 = vector.shape_cast %43 : vector<1x8x32xbf16> to vector<8x32xbf16>
    %cst_19 = arith.constant dense<0.000000e+00> : vector<8x512xf32>
    %45 = tpu.matmul %44, %0, %cst_19 {dimension_numbers = #tpu.dot_dimension_numbers<[1], [0], [0], [1], [0, 0, 1, 1], [], []>} : vector<8x32xbf16>, vector<32x512xbf16>, vector<8x512xf32> -> vector<8x512xf32>
    %46 = arith.truncf %41 : vector<8x128xf32> to vector<8x128xbf16>
    %cst_20 = arith.constant dense<0.000000e+00> : vector<8x512xf32>
    %47 = tpu.matmul %46, %1, %cst_20 {dimension_numbers = #tpu.dot_dimension_numbers<[1], [0], [0], [1], [0, 0, 1, 1], [], []>} : vector<8x128xbf16>, vector<128x512xbf16>, vector<8x512xf32> -> vector<8x512xf32>
    %48 = arith.addf %45, %47 : vector<8x512xf32>
    %49 = arith.addf %48, %4 : vector<8x512xf32>
    %50 = vector.extract_strided_slice %49 {offsets = [0, 0], sizes = [8, 128], strides = [1, 1]} : vector<8x512xf32> to vector<8x128xf32>
    %51 = arith.negf %50 : vector<8x128xf32>
    %52 = math.exp %51 : vector<8x128xf32>
    %cst_21 = arith.constant 1.000000e+00 : f32
    %53 = vector.broadcast %cst_21 : f32 to vector<8x128xf32>
    %54 = arith.addf %53, %52 : vector<8x128xf32>
    %55 = arith.divf %53, %54 : vector<8x128xf32>
    %56 = vector.extract_strided_slice %49 {offsets = [0, 128], sizes = [8, 128], strides = [1, 1]} : vector<8x512xf32> to vector<8x128xf32>
    %57 = arith.negf %56 : vector<8x128xf32>
    %58 = math.exp %57 : vector<8x128xf32>
    %cst_22 = arith.constant 1.000000e+00 : f32
    %59 = vector.broadcast %cst_22 : f32 to vector<8x128xf32>
    %60 = arith.addf %59, %58 : vector<8x128xf32>
    %61 = arith.divf %59, %60 : vector<8x128xf32>
    %62 = vector.extract_strided_slice %49 {offsets = [0, 256], sizes = [8, 128], strides = [1, 1]} : vector<8x512xf32> to vector<8x128xf32>
    %63 = math.tanh %62 : vector<8x128xf32>
    %64 = vector.extract_strided_slice %49 {offsets = [0, 384], sizes = [8, 128], strides = [1, 1]} : vector<8x512xf32> to vector<8x128xf32>
    %65 = arith.negf %64 : vector<8x128xf32>
    %66 = math.exp %65 : vector<8x128xf32>
    %cst_23 = arith.constant 1.000000e+00 : f32
    %67 = vector.broadcast %cst_23 : f32 to vector<8x128xf32>
    %68 = arith.addf %67, %66 : vector<8x128xf32>
    %69 = arith.divf %67, %68 : vector<8x128xf32>
    %70 = arith.mulf %55, %39 : vector<8x128xf32>
    %71 = arith.mulf %61, %63 : vector<8x128xf32>
    %72 = arith.addf %70, %71 : vector<8x128xf32>
    %73 = math.tanh %72 : vector<8x128xf32>
    %74 = arith.mulf %69, %73 : vector<8x128xf32>
    %c2_i32 = arith.constant 2 : i32
    %75 = arith.index_cast %c2_i32 : i32 to index
    %c0_24 = arith.constant 0 : index
    %c0_25 = arith.constant 0 : index
    %76 = vector.load %arg1[%75, %c0_24, %c0_25] : memref<8x8x32xbf16, #tpu.memory_space<vmem>>, vector<1x8x32xbf16>
    %77 = vector.shape_cast %76 : vector<1x8x32xbf16> to vector<8x32xbf16>
    %cst_26 = arith.constant dense<0.000000e+00> : vector<8x512xf32>
    %78 = tpu.matmul %77, %0, %cst_26 {dimension_numbers = #tpu.dot_dimension_numbers<[1], [0], [0], [1], [0, 0, 1, 1], [], []>} : vector<8x32xbf16>, vector<32x512xbf16>, vector<8x512xf32> -> vector<8x512xf32>
    %79 = arith.truncf %74 : vector<8x128xf32> to vector<8x128xbf16>
    %cst_27 = arith.constant dense<0.000000e+00> : vector<8x512xf32>
    %80 = tpu.matmul %79, %1, %cst_27 {dimension_numbers = #tpu.dot_dimension_numbers<[1], [0], [0], [1], [0, 0, 1, 1], [], []>} : vector<8x128xbf16>, vector<128x512xbf16>, vector<8x512xf32> -> vector<8x512xf32>
    %81 = arith.addf %78, %80 : vector<8x512xf32>
    %82 = arith.addf %81, %4 : vector<8x512xf32>
    %83 = vector.extract_strided_slice %82 {offsets = [0, 0], sizes = [8, 128], strides = [1, 1]} : vector<8x512xf32> to vector<8x128xf32>
    %84 = arith.negf %83 : vector<8x128xf32>
    %85 = math.exp %84 : vector<8x128xf32>
    %cst_28 = arith.constant 1.000000e+00 : f32
    %86 = vector.broadcast %cst_28 : f32 to vector<8x128xf32>
    %87 = arith.addf %86, %85 : vector<8x128xf32>
    %88 = arith.divf %86, %87 : vector<8x128xf32>
    %89 = vector.extract_strided_slice %82 {offsets = [0, 128], sizes = [8, 128], strides = [1, 1]} : vector<8x512xf32> to vector<8x128xf32>
    %90 = arith.negf %89 : vector<8x128xf32>
    %91 = math.exp %90 : vector<8x128xf32>
    %cst_29 = arith.constant 1.000000e+00 : f32
    %92 = vector.broadcast %cst_29 : f32 to vector<8x128xf32>
    %93 = arith.addf %92, %91 : vector<8x128xf32>
    %94 = arith.divf %92, %93 : vector<8x128xf32>
    %95 = vector.extract_strided_slice %82 {offsets = [0, 256], sizes = [8, 128], strides = [1, 1]} : vector<8x512xf32> to vector<8x128xf32>
    %96 = math.tanh %95 : vector<8x128xf32>
    %97 = vector.extract_strided_slice %82 {offsets = [0, 384], sizes = [8, 128], strides = [1, 1]} : vector<8x512xf32> to vector<8x128xf32>
    %98 = arith.negf %97 : vector<8x128xf32>
    %99 = math.exp %98 : vector<8x128xf32>
    %cst_30 = arith.constant 1.000000e+00 : f32
    %100 = vector.broadcast %cst_30 : f32 to vector<8x128xf32>
    %101 = arith.addf %100, %99 : vector<8x128xf32>
    %102 = arith.divf %100, %101 : vector<8x128xf32>
    %103 = arith.mulf %88, %72 : vector<8x128xf32>
    %104 = arith.mulf %94, %96 : vector<8x128xf32>
    %105 = arith.addf %103, %104 : vector<8x128xf32>
    %106 = math.tanh %105 : vector<8x128xf32>
    %107 = arith.mulf %102, %106 : vector<8x128xf32>
    %c3_i32 = arith.constant 3 : i32
    %108 = arith.index_cast %c3_i32 : i32 to index
    %c0_31 = arith.constant 0 : index
    %c0_32 = arith.constant 0 : index
    %109 = vector.load %arg1[%108, %c0_31, %c0_32] : memref<8x8x32xbf16, #tpu.memory_space<vmem>>, vector<1x8x32xbf16>
    %110 = vector.shape_cast %109 : vector<1x8x32xbf16> to vector<8x32xbf16>
    %cst_33 = arith.constant dense<0.000000e+00> : vector<8x512xf32>
    %111 = tpu.matmul %110, %0, %cst_33 {dimension_numbers = #tpu.dot_dimension_numbers<[1], [0], [0], [1], [0, 0, 1, 1], [], []>} : vector<8x32xbf16>, vector<32x512xbf16>, vector<8x512xf32> -> vector<8x512xf32>
    %112 = arith.truncf %107 : vector<8x128xf32> to vector<8x128xbf16>
    %cst_34 = arith.constant dense<0.000000e+00> : vector<8x512xf32>
    %113 = tpu.matmul %112, %1, %cst_34 {dimension_numbers = #tpu.dot_dimension_numbers<[1], [0], [0], [1], [0, 0, 1, 1], [], []>} : vector<8x128xbf16>, vector<128x512xbf16>, vector<8x512xf32> -> vector<8x512xf32>
    %114 = arith.addf %111, %113 : vector<8x512xf32>
    %115 = arith.addf %114, %4 : vector<8x512xf32>
    %116 = vector.extract_strided_slice %115 {offsets = [0, 0], sizes = [8, 128], strides = [1, 1]} : vector<8x512xf32> to vector<8x128xf32>
    %117 = arith.negf %116 : vector<8x128xf32>
    %118 = math.exp %117 : vector<8x128xf32>
    %cst_35 = arith.constant 1.000000e+00 : f32
    %119 = vector.broadcast %cst_35 : f32 to vector<8x128xf32>
    %120 = arith.addf %119, %118 : vector<8x128xf32>
    %121 = arith.divf %119, %120 : vector<8x128xf32>
    %122 = vector.extract_strided_slice %115 {offsets = [0, 128], sizes = [8, 128], strides = [1, 1]} : vector<8x512xf32> to vector<8x128xf32>
    %123 = arith.negf %122 : vector<8x128xf32>
    %124 = math.exp %123 : vector<8x128xf32>
    %cst_36 = arith.constant 1.000000e+00 : f32
    %125 = vector.broadcast %cst_36 : f32 to vector<8x128xf32>
    %126 = arith.addf %125, %124 : vector<8x128xf32>
    %127 = arith.divf %125, %126 : vector<8x128xf32>
    %128 = vector.extract_strided_slice %115 {offsets = [0, 256], sizes = [8, 128], strides = [1, 1]} : vector<8x512xf32> to vector<8x128xf32>
    %129 = math.tanh %128 : vector<8x128xf32>
    %130 = vector.extract_strided_slice %115 {offsets = [0, 384], sizes = [8, 128], strides = [1, 1]} : vector<8x512xf32> to vector<8x128xf32>
    %131 = arith.negf %130 : vector<8x128xf32>
    %132 = math.exp %131 : vector<8x128xf32>
    %cst_37 = arith.constant 1.000000e+00 : f32
    %133 = vector.broadcast %cst_37 : f32 to vector<8x128xf32>
    %134 = arith.addf %133, %132 : vector<8x128xf32>
    %135 = arith.divf %133, %134 : vector<8x128xf32>
    %136 = arith.mulf %121, %105 : vector<8x128xf32>
    %137 = arith.mulf %127, %129 : vector<8x128xf32>
    %138 = arith.addf %136, %137 : vector<8x128xf32>
    %139 = math.tanh %138 : vector<8x128xf32>
    %140 = arith.mulf %135, %139 : vector<8x128xf32>
    %c4_i32 = arith.constant 4 : i32
    %141 = arith.index_cast %c4_i32 : i32 to index
    %c0_38 = arith.constant 0 : index
    %c0_39 = arith.constant 0 : index
    %142 = vector.load %arg1[%141, %c0_38, %c0_39] : memref<8x8x32xbf16, #tpu.memory_space<vmem>>, vector<1x8x32xbf16>
    %143 = vector.shape_cast %142 : vector<1x8x32xbf16> to vector<8x32xbf16>
    %cst_40 = arith.constant dense<0.000000e+00> : vector<8x512xf32>
    %144 = tpu.matmul %143, %0, %cst_40 {dimension_numbers = #tpu.dot_dimension_numbers<[1], [0], [0], [1], [0, 0, 1, 1], [], []>} : vector<8x32xbf16>, vector<32x512xbf16>, vector<8x512xf32> -> vector<8x512xf32>
    %145 = arith.truncf %140 : vector<8x128xf32> to vector<8x128xbf16>
    %cst_41 = arith.constant dense<0.000000e+00> : vector<8x512xf32>
    %146 = tpu.matmul %145, %1, %cst_41 {dimension_numbers = #tpu.dot_dimension_numbers<[1], [0], [0], [1], [0, 0, 1, 1], [], []>} : vector<8x128xbf16>, vector<128x512xbf16>, vector<8x512xf32> -> vector<8x512xf32>
    %147 = arith.addf %144, %146 : vector<8x512xf32>
    %148 = arith.addf %147, %4 : vector<8x512xf32>
    %149 = vector.extract_strided_slice %148 {offsets = [0, 0], sizes = [8, 128], strides = [1, 1]} : vector<8x512xf32> to vector<8x128xf32>
    %150 = arith.negf %149 : vector<8x128xf32>
    %151 = math.exp %150 : vector<8x128xf32>
    %cst_42 = arith.constant 1.000000e+00 : f32
    %152 = vector.broadcast %cst_42 : f32 to vector<8x128xf32>
    %153 = arith.addf %152, %151 : vector<8x128xf32>
    %154 = arith.divf %152, %153 : vector<8x128xf32>
    %155 = vector.extract_strided_slice %148 {offsets = [0, 128], sizes = [8, 128], strides = [1, 1]} : vector<8x512xf32> to vector<8x128xf32>
    %156 = arith.negf %155 : vector<8x128xf32>
    %157 = math.exp %156 : vector<8x128xf32>
    %cst_43 = arith.constant 1.000000e+00 : f32
    %158 = vector.broadcast %cst_43 : f32 to vector<8x128xf32>
    %159 = arith.addf %158, %157 : vector<8x128xf32>
    %160 = arith.divf %158, %159 : vector<8x128xf32>
    %161 = vector.extract_strided_slice %148 {offsets = [0, 256], sizes = [8, 128], strides = [1, 1]} : vector<8x512xf32> to vector<8x128xf32>
    %162 = math.tanh %161 : vector<8x128xf32>
    %163 = vector.extract_strided_slice %148 {offsets = [0, 384], sizes = [8, 128], strides = [1, 1]} : vector<8x512xf32> to vector<8x128xf32>
    %164 = arith.negf %163 : vector<8x128xf32>
    %165 = math.exp %164 : vector<8x128xf32>
    %cst_44 = arith.constant 1.000000e+00 : f32
    %166 = vector.broadcast %cst_44 : f32 to vector<8x128xf32>
    %167 = arith.addf %166, %165 : vector<8x128xf32>
    %168 = arith.divf %166, %167 : vector<8x128xf32>
    %169 = arith.mulf %154, %138 : vector<8x128xf32>
    %170 = arith.mulf %160, %162 : vector<8x128xf32>
    %171 = arith.addf %169, %170 : vector<8x128xf32>
    %172 = math.tanh %171 : vector<8x128xf32>
    %173 = arith.mulf %168, %172 : vector<8x128xf32>
    %c5_i32 = arith.constant 5 : i32
    %174 = arith.index_cast %c5_i32 : i32 to index
    %c0_45 = arith.constant 0 : index
    %c0_46 = arith.constant 0 : index
    %175 = vector.load %arg1[%174, %c0_45, %c0_46] : memref<8x8x32xbf16, #tpu.memory_space<vmem>>, vector<1x8x32xbf16>
    %176 = vector.shape_cast %175 : vector<1x8x32xbf16> to vector<8x32xbf16>
    %cst_47 = arith.constant dense<0.000000e+00> : vector<8x512xf32>
    %177 = tpu.matmul %176, %0, %cst_47 {dimension_numbers = #tpu.dot_dimension_numbers<[1], [0], [0], [1], [0, 0, 1, 1], [], []>} : vector<8x32xbf16>, vector<32x512xbf16>, vector<8x512xf32> -> vector<8x512xf32>
    %178 = arith.truncf %173 : vector<8x128xf32> to vector<8x128xbf16>
    %cst_48 = arith.constant dense<0.000000e+00> : vector<8x512xf32>
    %179 = tpu.matmul %178, %1, %cst_48 {dimension_numbers = #tpu.dot_dimension_numbers<[1], [0], [0], [1], [0, 0, 1, 1], [], []>} : vector<8x128xbf16>, vector<128x512xbf16>, vector<8x512xf32> -> vector<8x512xf32>
    %180 = arith.addf %177, %179 : vector<8x512xf32>
    %181 = arith.addf %180, %4 : vector<8x512xf32>
    %182 = vector.extract_strided_slice %181 {offsets = [0, 0], sizes = [8, 128], strides = [1, 1]} : vector<8x512xf32> to vector<8x128xf32>
    %183 = arith.negf %182 : vector<8x128xf32>
    %184 = math.exp %183 : vector<8x128xf32>
    %cst_49 = arith.constant 1.000000e+00 : f32
    %185 = vector.broadcast %cst_49 : f32 to vector<8x128xf32>
    %186 = arith.addf %185, %184 : vector<8x128xf32>
    %187 = arith.divf %185, %186 : vector<8x128xf32>
    %188 = vector.extract_strided_slice %181 {offsets = [0, 128], sizes = [8, 128], strides = [1, 1]} : vector<8x512xf32> to vector<8x128xf32>
    %189 = arith.negf %188 : vector<8x128xf32>
    %190 = math.exp %189 : vector<8x128xf32>
    %cst_50 = arith.constant 1.000000e+00 : f32
    %191 = vector.broadcast %cst_50 : f32 to vector<8x128xf32>
    %192 = arith.addf %191, %190 : vector<8x128xf32>
    %193 = arith.divf %191, %192 : vector<8x128xf32>
    %194 = vector.extract_strided_slice %181 {offsets = [0, 256], sizes = [8, 128], strides = [1, 1]} : vector<8x512xf32> to vector<8x128xf32>
    %195 = math.tanh %194 : vector<8x128xf32>
    %196 = vector.extract_strided_slice %181 {offsets = [0, 384], sizes = [8, 128], strides = [1, 1]} : vector<8x512xf32> to vector<8x128xf32>
    %197 = arith.negf %196 : vector<8x128xf32>
    %198 = math.exp %197 : vector<8x128xf32>
    %cst_51 = arith.constant 1.000000e+00 : f32
    %199 = vector.broadcast %cst_51 : f32 to vector<8x128xf32>
    %200 = arith.addf %199, %198 : vector<8x128xf32>
    %201 = arith.divf %199, %200 : vector<8x128xf32>
    %202 = arith.mulf %187, %171 : vector<8x128xf32>
    %203 = arith.mulf %193, %195 : vector<8x128xf32>
    %204 = arith.addf %202, %203 : vector<8x128xf32>
    %205 = math.tanh %204 : vector<8x128xf32>
    %206 = arith.mulf %201, %205 : vector<8x128xf32>
    %c6_i32 = arith.constant 6 : i32
    %207 = arith.index_cast %c6_i32 : i32 to index
    %c0_52 = arith.constant 0 : index
    %c0_53 = arith.constant 0 : index
    %208 = vector.load %arg1[%207, %c0_52, %c0_53] : memref<8x8x32xbf16, #tpu.memory_space<vmem>>, vector<1x8x32xbf16>
    %209 = vector.shape_cast %208 : vector<1x8x32xbf16> to vector<8x32xbf16>
    %cst_54 = arith.constant dense<0.000000e+00> : vector<8x512xf32>
    %210 = tpu.matmul %209, %0, %cst_54 {dimension_numbers = #tpu.dot_dimension_numbers<[1], [0], [0], [1], [0, 0, 1, 1], [], []>} : vector<8x32xbf16>, vector<32x512xbf16>, vector<8x512xf32> -> vector<8x512xf32>
    %211 = arith.truncf %206 : vector<8x128xf32> to vector<8x128xbf16>
    %cst_55 = arith.constant dense<0.000000e+00> : vector<8x512xf32>
    %212 = tpu.matmul %211, %1, %cst_55 {dimension_numbers = #tpu.dot_dimension_numbers<[1], [0], [0], [1], [0, 0, 1, 1], [], []>} : vector<8x128xbf16>, vector<128x512xbf16>, vector<8x512xf32> -> vector<8x512xf32>
    %213 = arith.addf %210, %212 : vector<8x512xf32>
    %214 = arith.addf %213, %4 : vector<8x512xf32>
    %215 = vector.extract_strided_slice %214 {offsets = [0, 0], sizes = [8, 128], strides = [1, 1]} : vector<8x512xf32> to vector<8x128xf32>
    %216 = arith.negf %215 : vector<8x128xf32>
    %217 = math.exp %216 : vector<8x128xf32>
    %cst_56 = arith.constant 1.000000e+00 : f32
    %218 = vector.broadcast %cst_56 : f32 to vector<8x128xf32>
    %219 = arith.addf %218, %217 : vector<8x128xf32>
    %220 = arith.divf %218, %219 : vector<8x128xf32>
    %221 = vector.extract_strided_slice %214 {offsets = [0, 128], sizes = [8, 128], strides = [1, 1]} : vector<8x512xf32> to vector<8x128xf32>
    %222 = arith.negf %221 : vector<8x128xf32>
    %223 = math.exp %222 : vector<8x128xf32>
    %cst_57 = arith.constant 1.000000e+00 : f32
    %224 = vector.broadcast %cst_57 : f32 to vector<8x128xf32>
    %225 = arith.addf %224, %223 : vector<8x128xf32>
    %226 = arith.divf %224, %225 : vector<8x128xf32>
    %227 = vector.extract_strided_slice %214 {offsets = [0, 256], sizes = [8, 128], strides = [1, 1]} : vector<8x512xf32> to vector<8x128xf32>
    %228 = math.tanh %227 : vector<8x128xf32>
    %229 = vector.extract_strided_slice %214 {offsets = [0, 384], sizes = [8, 128], strides = [1, 1]} : vector<8x512xf32> to vector<8x128xf32>
    %230 = arith.negf %229 : vector<8x128xf32>
    %231 = math.exp %230 : vector<8x128xf32>
    %cst_58 = arith.constant 1.000000e+00 : f32
    %232 = vector.broadcast %cst_58 : f32 to vector<8x128xf32>
    %233 = arith.addf %232, %231 : vector<8x128xf32>
    %234 = arith.divf %232, %233 : vector<8x128xf32>
    %235 = arith.mulf %220, %204 : vector<8x128xf32>
    %236 = arith.mulf %226, %228 : vector<8x128xf32>
    %237 = arith.addf %235, %236 : vector<8x128xf32>
    %238 = math.tanh %237 : vector<8x128xf32>
    %239 = arith.mulf %234, %238 : vector<8x128xf32>
    %c7_i32 = arith.constant 7 : i32
    %240 = arith.index_cast %c7_i32 : i32 to index
    %c0_59 = arith.constant 0 : index
    %c0_60 = arith.constant 0 : index
    %241 = vector.load %arg1[%240, %c0_59, %c0_60] : memref<8x8x32xbf16, #tpu.memory_space<vmem>>, vector<1x8x32xbf16>
    %242 = vector.shape_cast %241 : vector<1x8x32xbf16> to vector<8x32xbf16>
    %cst_61 = arith.constant dense<0.000000e+00> : vector<8x512xf32>
    %243 = tpu.matmul %242, %0, %cst_61 {dimension_numbers = #tpu.dot_dimension_numbers<[1], [0], [0], [1], [0, 0, 1, 1], [], []>} : vector<8x32xbf16>, vector<32x512xbf16>, vector<8x512xf32> -> vector<8x512xf32>
    %244 = arith.truncf %239 : vector<8x128xf32> to vector<8x128xbf16>
    %cst_62 = arith.constant dense<0.000000e+00> : vector<8x512xf32>
    %245 = tpu.matmul %244, %1, %cst_62 {dimension_numbers = #tpu.dot_dimension_numbers<[1], [0], [0], [1], [0, 0, 1, 1], [], []>} : vector<8x128xbf16>, vector<128x512xbf16>, vector<8x512xf32> -> vector<8x512xf32>
    %246 = arith.addf %243, %245 : vector<8x512xf32>
    %247 = arith.addf %246, %4 : vector<8x512xf32>
    %248 = vector.extract_strided_slice %247 {offsets = [0, 0], sizes = [8, 128], strides = [1, 1]} : vector<8x512xf32> to vector<8x128xf32>
    %249 = arith.negf %248 : vector<8x128xf32>
    %250 = math.exp %249 : vector<8x128xf32>
    %cst_63 = arith.constant 1.000000e+00 : f32
    %251 = vector.broadcast %cst_63 : f32 to vector<8x128xf32>
    %252 = arith.addf %251, %250 : vector<8x128xf32>
    %253 = arith.divf %251, %252 : vector<8x128xf32>
    %254 = vector.extract_strided_slice %247 {offsets = [0, 128], sizes = [8, 128], strides = [1, 1]} : vector<8x512xf32> to vector<8x128xf32>
    %255 = arith.negf %254 : vector<8x128xf32>
    %256 = math.exp %255 : vector<8x128xf32>
    %cst_64 = arith.constant 1.000000e+00 : f32
    %257 = vector.broadcast %cst_64 : f32 to vector<8x128xf32>
    %258 = arith.addf %257, %256 : vector<8x128xf32>
    %259 = arith.divf %257, %258 : vector<8x128xf32>
    %260 = vector.extract_strided_slice %247 {offsets = [0, 256], sizes = [8, 128], strides = [1, 1]} : vector<8x512xf32> to vector<8x128xf32>
    %261 = math.tanh %260 : vector<8x128xf32>
    %262 = vector.extract_strided_slice %247 {offsets = [0, 384], sizes = [8, 128], strides = [1, 1]} : vector<8x512xf32> to vector<8x128xf32>
    %263 = arith.negf %262 : vector<8x128xf32>
    %264 = math.exp %263 : vector<8x128xf32>
    %cst_65 = arith.constant 1.000000e+00 : f32
    %265 = vector.broadcast %cst_65 : f32 to vector<8x128xf32>
    %266 = arith.addf %265, %264 : vector<8x128xf32>
    %267 = arith.divf %265, %266 : vector<8x128xf32>
    %268 = arith.mulf %253, %237 : vector<8x128xf32>
    %269 = arith.mulf %259, %261 : vector<8x128xf32>
    %270 = arith.addf %268, %269 : vector<8x128xf32>
    %271 = math.tanh %270 : vector<8x128xf32>
    %272 = arith.mulf %267, %271 : vector<8x128xf32>
    %c8_i32 = arith.constant 8 : i32
    %273 = vector.broadcast %5 : vector<1x128xf32> to vector<8x128xf32>
    %274 = arith.mulf %272, %273 : vector<8x128xf32>
    %cst_66 = arith.constant dense<0.000000e+00> : vector<8xf32>
    %275 = vector.multi_reduction <add>, %274, %cst_66 [1] : vector<8x128xf32> to vector<8xf32>
    %276 = vector.shape_cast %275 : vector<8xf32> to vector<8x1xf32>
    %277 = vector.broadcast %6 : vector<1x1xf32> to vector<8x1xf32>
    %278 = arith.addf %276, %277 : vector<8x1xf32>
    %279 = arith.negf %278 : vector<8x1xf32>
    %280 = math.exp %279 : vector<8x1xf32>
    %cst_67 = arith.constant 1.000000e+00 : f32
    %281 = vector.broadcast %cst_67 : f32 to vector<8x1xf32>
    %282 = arith.addf %281, %280 : vector<8x1xf32>
    %283 = arith.divf %281, %282 : vector<8x1xf32>
    %c0_68 = arith.constant 0 : index
    %c0_69 = arith.constant 0 : index
    %284 = vector.load %arg7[%c0_68, %c0_69] : memref<8x1xf32, #tpu.memory_space<vmem>>, vector<8x1xf32>
    tpu.vector_store %arg7[%c0_68, %c0_69], %283 {strides = array<i32>} : memref<8x1xf32, #tpu.memory_space<vmem>>, vector<8x1xf32>,
    return
  }
  func.func @transform_0(%arg0: i32) -> (i32, i32, i32) {
    %c0_i32 = arith.constant 0 : i32
    %c0_i32_0 = arith.constant 0 : i32
    %c0_i32_1 = arith.constant 0 : i32
    return %c0_i32, %arg0, %c0_i32_0 : i32, i32, i32
  }
  func.func @transform_1(%arg0: i32) -> (i32, i32) {
    %c0_i32 = arith.constant 0 : i32
    %c0_i32_0 = arith.constant 0 : i32
    %c0_i32_1 = arith.constant 0 : i32
    return %c0_i32, %c0_i32_0 : i32, i32
  }
  func.func @transform_2(%arg0: i32) -> (i32, i32) {
    %c0_i32 = arith.constant 0 : i32
    %c0_i32_0 = arith.constant 0 : i32
    %c0_i32_1 = arith.constant 0 : i32
    return %c0_i32, %c0_i32_0 : i32, i32
  }
  func.func @transform_3(%arg0: i32) -> (i32, i32) {
    %c0_i32 = arith.constant 0 : i32
    %c0_i32_0 = arith.constant 0 : i32
    %c0_i32_1 = arith.constant 0 : i32
    return %c0_i32, %c0_i32_0 : i32, i32
  }
  func.func @transform_4(%arg0: i32) -> (i32, i32) {
    %c0_i32 = arith.constant 0 : i32
    %c0_i32_0 = arith.constant 0 : i32
    %c0_i32_1 = arith.constant 0 : i32
    return %c0_i32, %c0_i32_0 : i32, i32
  }
  func.func @transform_5(%arg0: i32) -> (i32, i32) {
    %c0_i32 = arith.constant 0 : i32
    %c0_i32_0 = arith.constant 0 : i32
    %c0_i32_1 = arith.constant 0 : i32
    return %c0_i32, %c0_i32_0 : i32, i32
  }
  func.func @transform_6(%arg0: i32) -> (i32, i32) {
    %c0_i32 = arith.constant 0 : i32
    %c0_i32_0 = arith.constant 0 : i32
    return %arg0, %c0_i32 : i32, i32
  }
}

</mosaic_0001>

<bundles_post_ra>
// kernel: tpu_custom_call.1
= control target key start
LH: loop header
LB: loop body
LE: loop exit
PB: predicated region body
PF: predicated region fallthrough
CT: control target
= control target key end

     0   :  { %s3028_s0 = inlined_call_operand.hbm [shape: bf16[8,8,32], index: 0, kind: input, shape index: {}]   ;;  %s3029_s1 = inlined_call_operand.hbm [shape: bf16[32,512], index: 1, kind: input, shape index: {}]   ;;  %s3030_s2 = inlined_call_operand.hbm [shape: bf16[128,512], index: 2, kind: input, shape index: {}]   ;;  %s3031_s3 = inlined_call_operand.vmem [shape: f32[1,512], index: 3, kind: input, shape index: {}]   ;;  %s3032_s4 = inlined_call_operand.vmem [shape: f32[1,128], index: 4, kind: input, shape index: {}]   ;;  %s3033_s5 = inlined_call_operand.<no memory space> [shape: f32[1,1], index: 5, kind: input, shape index: {}]   ;;  %s3034_s6 = inlined_call_operand.vmem [shape: f32[8,1], index: 6, kind: output, shape index: {}]  }
   0x1   :  { %v11_v0 = vstv %s3033_s5 }
   0x2   :  { %12 = vst [vmem:[#allocation2] sm:$0x1] %v11_v0 }
   0x3   :  { %13 = vsyncpa [#allocation4], 0 }
   0x4   :  { %14 = vsyncpa [#allocation6], 0  ;;  %s2337_s23 = smov [#allocation5]   ;;  %s2267_s27 = scalar_lea.hbm %s3029_s1, 1024 }
   0x5   :  { %s32_s24 = sshll.u32 %s2337_s23, 4  ;;  %p2268_p0 = scmp.ne.s32.totalorder %s3029_s1, %s2267_s27  ;;  %s33_s24 = int_to_ptr.vmem [resolvable:$true] %s32_s24 }
   0x6   :  { %p2271_p1 = scmp.lt.u32.totalorder %s2267_s27, %s3029_s1 }
   0x8   :  { %p2273_p2 = pnand %p2271_p1, %p2268_p0 }
   0xa   :  { %2276 = shalt.err (!%p2273_p2)
}
   0xb   :  { %s2277_s5 = scalar_lea.vmem %s33_s24, 1024  ;;  %p2282_p4 = scmp.lt.s32.totalorder %s33_s24, %s33_s24 }
   0xc   :  { %p2278_p3 = scmp.ne.s32.totalorder %s33_s24, %s2277_s5  ;;  %p2283_p5 = scmp.lt.s32.totalorder %s2277_s5, %s2277_s5 }
   0xe   :  { %p2284_p6 = por %p2283_p5, %p2282_p4 }
  0x10   :  { %p2285_p7 = pnand %p2284_p6, %p2278_p3 }
  0x12   :  { %2288 = shalt.err (!%p2285_p7)
}
  0x13   :  { %s2338_s8 = smov 256   ;;  %s2339_s9 = smov 16  }
  0x14   :  { %38 = dma.hbm_to_vmem [thread:$0]  %s3029_s1, 1024, %s33_s24, [#allocation6], %s2338_s8, %s2338_s8, %s2339_s9  }
  0x15   :  { %s2340_s12 = smov [#allocation3]   ;;  %s2289_s16 = scalar_lea.hbm %s3028_s0, 512 }
  0x16   :  { %s20_s13 = sshll.u32 %s2340_s12, 4  ;;  %p2290_p8 = scmp.ne.s32.totalorder %s3028_s0, %s2289_s16  ;;  %s21_s13 = int_to_ptr.vmem [resolvable:$true] %s20_s13 }
  0x17   :  { %p2293_p9 = scmp.lt.u32.totalorder %s2289_s16, %s3028_s0 }
  0x19   :  { %p2295_p10 = pnand %p2293_p9, %p2290_p8 }
  0x1b   :  { %2298 = shalt.err (!%p2295_p10)
}
  0x1c   :  { %s2299_s21 = scalar_lea.vmem %s21_s13, 512  ;;  %p2304_p12 = scmp.lt.s32.totalorder %s21_s13, %s21_s13 }
  0x1d   :  { %p2300_p11 = scmp.ne.s32.totalorder %s21_s13, %s2299_s21  ;;  %p2305_p13 = scmp.lt.s32.totalorder %s2299_s21, %s2299_s21 }
  0x1f   :  { %p2306_p0 = por %p2305_p13, %p2304_p12 }
  0x21   :  { %p2307_p1 = pnand %p2306_p0, %p2300_p11 }
  0x23   :  { %2310 = shalt.err (!%p2307_p1)
}
  0x24   :  { %s2341_s1 = smov 64   ;;  %s2342_s22 = smov 4  }
  0x25   :  { %26 = dma.hbm_to_vmem [thread:$0]  %s3028_s0, 512, %s21_s13, [#allocation4], %s2341_s1, %s2341_s1, %s2342_s22  }
  0x26   :  { %s2343_s25 = smov [#allocation7]   ;;  %s2311_s29 = scalar_lea.hbm %s3030_s2, 4096 }
  0x27   :  { %s44_s26 = sshll.u32 %s2343_s25, 4  ;;  %p2312_p2 = scmp.ne.s32.totalorder %s3030_s2, %s2311_s29  ;;  %s45_s26 = int_to_ptr.vmem [resolvable:$true] %s44_s26 }
  0x28   :  { %p2315_p3 = scmp.lt.u32.totalorder %s2311_s29, %s3030_s2 }
  0x2a   :  { %p2317_p4 = pnand %p2315_p3, %p2312_p2 }
  0x2c   :  { %2320 = shalt.err (!%p2317_p4)
}
  0x2d   :  { %s2321_s11 = scalar_lea.vmem %s45_s26, 4096  ;;  %p2326_p6 = scmp.lt.s32.totalorder %s45_s26, %s45_s26 }
  0x2e   :  { %p2322_p5 = scmp.ne.s32.totalorder %s45_s26, %s2321_s11  ;;  %p2327_p7 = scmp.lt.s32.totalorder %s2321_s11, %s2321_s11 }
  0x30   :  { %p2328_p8 = por %p2327_p7, %p2326_p6 }
  0x32   :  { %p2329_p9 = pnand %p2328_p8, %p2322_p5 }
  0x34   :  { %2332 = shalt.err (!%p2329_p9)
}
  0x35   :  { %50 = dma.hbm_to_vmem [thread:$0]  %s3030_s2, 4096, %s45_s26, [#allocation6], %s2338_s8, %s2338_s8, %s2339_s9  }
  0x36   :  { %2333 = dma.done.wait [#allocation4], 512  }
  0x37   :  { %2334 = vsyncadd [#allocation4], 4294966784 }
  0x38   :  { %2335 = dma.done.wait [#allocation6], 5120  }
  0x39   :  { %2336 = vsyncadd [#allocation6], 4294962176  ;;  %v3035_v1 = vmov 0   ;;  %v2427_v2 = vld [vmem:[#allocation7 + $0x4] ss:$16 sps:$4 sm:$0xff]   ;;  %vm414_vm0 = vcmask 261120   ;;  %v109_v43 = vlaneseq }
  0x3a   :  { %324 = vmatprep.mubr.bf16.mxu0 %v3035_v1  ;;  %365 = vmatprep.mubr.bf16.mxu1 %v3035_v1  ;;  %v2429_v3 = vld [vmem:[#allocation7] ss:$16 sps:$4 sm:$0xff]   ;;  %v2432_v4 = vld [vmem:[#allocation7 + $0x24] ss:$16 sps:$4 sm:$0xff]   ;;  %v2437_v6 = vld [vmem:[#allocation7 + $0xc] ss:$16 sps:$4 sm:$0xff]  }
  0x3b   :  { %292 = vmatprep.subr.bf16.mxu0 %v2427_v2  ;;  %v2434_v5 = vld [vmem:[#allocation7 + $0x20] ss:$16 sps:$4 sm:$0xff]   ;;  %v2440_v7 = vld [vmem:[#allocation7 + $0x44] ss:$16 sps:$4 sm:$0xff]   ;;  %v2442_v8 = vld [vmem:[#allocation7 + $0x8] ss:$16 sps:$4 sm:$0xff]   ;;  %333 = vmatprep.subr.bf16.mxu1 %v2437_v6 }
  0x3c   :  { %293 = vmatpush1.bf16.msra.mxu0 %v2429_v3  ;;  %334 = vmatpush1.bf16.msra.mxu1 %v2442_v8  ;;  %v2446_v9 = vld [vmem:[#allocation7 + $0x2c] ss:$16 sps:$4 sm:$0xff]   ;;  %v2449_v10 = vld [vmem:[#allocation7 + $0x40] ss:$16 sps:$4 sm:$0xff]   ;;  %v2451_v11 = vld [vmem:[#allocation7 + $0x64] ss:$16 sps:$4 sm:$0xff]  }
  0x3d   :  { %294 = vmatprep.subr.bf16.mxu0 %v2432_v4  ;;  %v2453_v12 = vld [vmem:[#allocation7 + $0x28] ss:$16 sps:$4 sm:$0xff]   ;;  %335 = vmatprep.subr.bf16.mxu1 %v2446_v9  ;;  %v2457_v13 = vld [vmem:[#allocation7 + $0x4c] ss:$16 sps:$4 sm:$0xff]   ;;  %v2460_v14 = vld [vmem:[#allocation7 + $0x60] ss:$16 sps:$4 sm:$0xff]  }
  0x3e   :  { %v2462_v15 = vld [vmem:[#allocation7 + $0x48] ss:$16 sps:$4 sm:$0xff]   ;;  %v2466_v16 = vld [vmem:[#allocation7 + $0x6c] ss:$16 sps:$4 sm:$0xff]   ;;  %v2469_v17 = vld [vmem:[#allocation7 + $0x84] ss:$16 sps:$4 sm:$0xff]  }
  0x3f   :  { %v2472_v18 = vld [vmem:[#allocation7 + $0x68] ss:$16 sps:$4 sm:$0xff]   ;;  %v2475_v19 = vld [vmem:[#allocation7 + $0x80] ss:$16 sps:$4 sm:$0xff]   ;;  %v2478_v20 = vld [vmem:[#allocation7 + $0x8c] ss:$16 sps:$4 sm:$0xff]  }
  0x40   :  { %295 = vmatpush1.bf16.msra.mxu0 %v2434_v5  ;;  %336 = vmatpush1.bf16.msra.mxu1 %v2453_v12  ;;  %v2481_v21 = vld [vmem:[#allocation7 + $0xa4] ss:$16 sps:$4 sm:$0xff]   ;;  %v2484_v22 = vld [vmem:[#allocation7 + $0x88] ss:$16 sps:$4 sm:$0xff]   ;;  %v2487_v23 = vld [vmem:[#allocation7 + $0xa0] ss:$16 sps:$4 sm:$0xff]  }
  0x41   :  { %296 = vmatprep.subr.bf16.mxu0 %v2440_v7  ;;  %337 = vmatprep.subr.bf16.mxu1 %v2457_v13  ;;  %v2490_v24 = vld [vmem:[#allocation7 + $0xac] ss:$16 sps:$4 sm:$0xff]   ;;  %v2493_v25 = vld [vmem:[#allocation7 + $0xc4] ss:$16 sps:$4 sm:$0xff]   ;;  %v2496_v26 = vld [vmem:[#allocation7 + $0xa8] ss:$16 sps:$4 sm:$0xff]  }
  0x42   :  { %v2499_v27 = vld [vmem:[#allocation7 + $0xc0] ss:$16 sps:$4 sm:$0xff]   ;;  %v2502_v28 = vld [vmem:[#allocation7 + $0xcc] ss:$16 sps:$4 sm:$0xff]   ;;  %v2505_v29 = vld [vmem:[#allocation7 + $0xe4] ss:$16 sps:$4 sm:$0xff]  }
  0x43   :  { %v2508_v30 = vld [vmem:[#allocation7 + $0xc8] ss:$16 sps:$4 sm:$0xff]   ;;  %v2511_v31 = vld [vmem:[#allocation7 + $0xe0] ss:$16 sps:$4 sm:$0xff]   ;;  %v2514_v32 = vld [vmem:[#allocation7 + $0xec] ss:$16 sps:$4 sm:$0xff]  }
  0x44   :  { %297 = vmatpush1.bf16.msra.mxu0 %v2449_v10  ;;  %338 = vmatpush1.bf16.msra.mxu1 %v2462_v15  ;;  %3049 = vst [vmem:[#allocation10_spill] sm:$0xff] %v2511_v31  ;;  %v2517_v33 = vld [vmem:[#allocation5 + $0x4] ss:$16 sps:$4 sm:$0xff]   ;;  %v2520_v34 = vld [vmem:[#allocation7 + $0xe8] ss:$16 sps:$4 sm:$0xff]   ;;  %v110_v44 = vshrl.u32 %v109_v43, 7 }
  0x45   :  { %298 = vmatprep.subr.bf16.mxu0 %v2451_v11  ;;  %339 = vmatprep.subr.bf16.mxu1 %v2466_v16  ;;  %3050 = vst [vmem:[#allocation11_spill] sm:$0xff] %v2517_v33  ;;  %3051 = vst [vmem:[#allocation12_spill] sm:$0xff] %v2520_v34  ;;  %v2523_v35 = vld [vmem:[#allocation5] ss:$16 sps:$4 sm:$0xff]   ;;  %v2527_v36 = vld [vmem:[#allocation5 + $0x24] ss:$16 sps:$4 sm:$0xff]  }
  0x46   :  { %v2529_v37 = vld [vmem:[#allocation5 + $0xc] ss:$16 sps:$4 sm:$0xff]   ;;  %v2533_v38 = vld [vmem:[#allocation5 + $0x8] ss:$16 sps:$4 sm:$0xff]   ;;  %v2536_v39 = vld [vmem:[#allocation5 + $0x20] ss:$16 sps:$4 sm:$0xff]  }
  0x47   :  { %3052 = vst [vmem:[#allocation13_spill] sm:$0xff] %v2529_v37  ;;  %v2539_v40 = vld [vmem:[#allocation5 + $0x2c] ss:$16 sps:$4 sm:$0xff]   ;;  %v2545_v41 = vld [vmem:[#allocation5 + $0x28] ss:$16 sps:$4 sm:$0xff]   ;;  %v111_v49 = vsub.s32 0, %v110_v44 }
  0x48   :  { %299 = vmatpush1.bf16.msra.mxu0 %v2460_v14  ;;  %340 = vmatpush1.bf16.msra.mxu1 %v2472_v18  ;;  %v131_v42 = vld [vmem:[#allocation3] sm:$0xf]  ;;  %v115_v52 = vsub.s32 1, %v110_v44  ;;  %v123_v63 = vsub.s32 3, %v110_v44  ;;  %vm1936_vm1 = vcmask 7168  }
  0x49   :  { %300 = vmatprep.subr.bf16.mxu0 %v2469_v17  ;;  %341 = vmatprep.subr.bf16.mxu1 %v2478_v20  ;;  %v107_v51 = vld [vmem:[%s3031_s3] sm:$0xf] }
  0x4a   :  { %v2592_v56 = vrot.slane %v107_v51, %v111_v49  ;;  %v2594_v58 = vrot.slane %v107_v51, %v115_v52 }
  0x4c   :  { %301 = vmatpush1.bf16.msra.mxu0 %v2475_v19  ;;  %342 = vmatpush1.bf16.msra.mxu1 %v2484_v22 }
  0x4d   :  { %302 = vmatprep.subr.bf16.mxu0 %v2481_v21  ;;  %343 = vmatprep.subr.bf16.mxu1 %v2490_v24 }
  0x50   :  { %303 = vmatpush1.bf16.msra.mxu0 %v2487_v23  ;;  %344 = vmatpush1.bf16.msra.mxu1 %v2496_v26 }
  0x51   :  { %304 = vmatprep.subr.bf16.mxu0 %v2493_v25  ;;  %345 = vmatprep.subr.bf16.mxu1 %v2502_v28 }
  0x54   :  { %305 = vmatpush1.bf16.msra.mxu0 %v2499_v27  ;;  %346 = vmatpush1.bf16.msra.mxu1 %v2508_v30 }
  0x55   :  { %306 = vmatprep.subr.bf16.mxu0 %v2505_v29  ;;  %347 = vmatprep.subr.bf16.mxu1 %v2514_v32 }
  0x58   :  { %307 = vmatpush1.bf16.msra.mxu0 %v2511_v31  ;;  %348 = vmatpush1.bf16.msra.mxu1 %v2520_v34 }
  0x59   :  { %418 = vmatprep.subr.bf16.mxu0 %v2517_v33  ;;  %459 = vmatprep.subr.bf16.mxu1 %v2529_v37 }
  0x5b   :  { %325 = vmatmul.mubr.bf16.vlgmr.msra.gmra.mrb[0].mxu0 %v3035_v1  ;;  %366 = vmatmul.mubr.bf16.vlgmr.msra.gmra.mrb[0].mxu1 %v3035_v1 }
  0x5c   :  { %419 = vmatpush1.bf16.msra.mxu0 %v2523_v35  ;;  %450 = vmatprep.mubr.bf16.mxu0 %v3035_v1 }
  0x5d   :  { %420 = vmatprep.subr.bf16.mxu0 %v2527_v36  ;;  %460 = vmatpush1.bf16.msra.mxu1 %v2533_v38 }
  0x5e   :  { %491 = vmatprep.mubr.bf16.mxu1 %v3035_v1  ;;  %461 = vmatprep.subr.bf16.mxu1 %v2539_v40 }
  0x60   :  { %421 = vmatpush1.bf16.msra.mxu0 %v2536_v39 }
  0x61   :  { %531 = vmatprep.subr.bf16.mxu0 %v2427_v2  ;;  %462 = vmatpush1.bf16.msra.mxu1 %v2545_v41 }
  0x62   :  { %572 = vmatprep.subr.bf16.mxu1 %v2437_v6 }
  0x63   :  { %1984 = vmatmul.mubr.msk.bf16.vlgmr.msra.gmra.mrb[4].mxu0 %vm414_vm0, %v131_v42 }
  0x64   :  { %532 = vmatpush1.bf16.msra.mxu0 %v2429_v3  ;;  %563 = vmatprep.mubr.bf16.mxu0 %v3035_v1 }
  0x65   :  { %533 = vmatprep.subr.bf16.mxu0 %v2432_v4  ;;  %1985 = vmatmul.mubr.msk.bf16.vlgmr.msra.gmra.mrb[4].mxu1 %vm414_vm0, %v131_v42 }
  0x66   :  { %573 = vmatpush1.bf16.msra.mxu1 %v2442_v8  ;;  %604 = vmatprep.mubr.bf16.mxu1 %v3035_v1 }
  0x67   :  { %574 = vmatprep.subr.bf16.mxu1 %v2446_v9 }
  0x68   :  { %534 = vmatpush1.bf16.msra.mxu0 %v2434_v5 }
  0x69   :  { %535 = vmatprep.subr.bf16.mxu0 %v2440_v7 }
  0x6a   :  { %575 = vmatpush1.bf16.msra.mxu1 %v2453_v12 }
  0x6b   :  { %576 = vmatprep.subr.bf16.mxu1 %v2457_v13 }
  0x6c   :  { %536 = vmatpush1.bf16.msra.mxu0 %v2449_v10 }
  0x6d   :  { %537 = vmatprep.subr.bf16.mxu0 %v2451_v11 }
  0x6e   :  { %577 = vmatpush1.bf16.msra.mxu1 %v2462_v15 }
  0x6f   :  { %578 = vmatprep.subr.bf16.mxu1 %v2466_v16 }
  0x70   :  { %538 = vmatpush1.bf16.msra.mxu0 %v2460_v14 }
  0x71   :  { %539 = vmatprep.subr.bf16.mxu0 %v2469_v17 }
  0x72   :  { %579 = vmatpush1.bf16.msra.mxu1 %v2472_v18 }
  0x73   :  { %580 = vmatprep.subr.bf16.mxu1 %v2478_v20 }
  0x74   :  { %540 = vmatpush1.bf16.msra.mxu0 %v2475_v19 }
  0x75   :  { %541 = vmatprep.subr.bf16.mxu0 %v2481_v21 }
  0x76   :  { %581 = vmatpush1.bf16.msra.mxu1 %v2484_v22 }
  0x77   :  { %582 = vmatprep.subr.bf16.mxu1 %v2490_v24 }
  0x78   :  { %542 = vmatpush1.bf16.msra.mxu0 %v2487_v23 }
  0x79   :  { %543 = vmatprep.subr.bf16.mxu0 %v2493_v25 }
  0x7a   :  { %583 = vmatpush1.bf16.msra.mxu1 %v2496_v26 }
  0x7b   :  { %584 = vmatprep.subr.bf16.mxu1 %v2502_v28 }
  0x7c   :  { %544 = vmatpush1.bf16.msra.mxu0 %v2499_v27 }
  0x7d   :  { %545 = vmatprep.subr.bf16.mxu0 %v2505_v29 }
  0x7e   :  { %585 = vmatpush1.bf16.msra.mxu1 %v2508_v30 }
  0x7f   :  { %586 = vmatprep.subr.bf16.mxu1 %v2514_v32 }
  0x80   :  { %546 = vmatpush1.bf16.msra.mxu0 %v2511_v31 }
  0x81   :  { %616 = vmatprep.subr.bf16.mxu0 %v2517_v33  ;;  %v2598_v33 = vrot.slane %v107_v51, %v123_v63 }
  0x82   :  { %587 = vmatpush1.bf16.msra.mxu1 %v2520_v34 }
  0x83   :  { %657 = vmatprep.subr.bf16.mxu1 %v2529_v37 }
 0x12e   :  { %v326_v45 = vpop.f32.mrb[0].mxu0  ;;  %v367_v50 = vpop.f32.mrb[0].mxu1 }
 0x12f   :  { %v328_v46 = vpop.f32.mrb[1].mxu0  ;;  %v369_v53 = vpop.f32.mrb[1].mxu1 }
 0x130   :  { %v330_v47 = vpop.f32.mrb[2].mxu0  ;;  %v371_v54 = vpop.f32.mrb[2].mxu1 }
 0x131   :  { %v331_v48 = vpop.f32.mrb[3].mxu0  ;;  %v372_v55 = vpop.f32.mrb[3].mxu1 }
 0x136   :  { %v452_v57 = vpop.f32.mrb[4].mxu0 }
 0x137   :  { %v453_v59 = vadd.f32 %v452_v57, %v326_v45  ;;  %v454_v60 = vpop.f32.mrb[5].mxu0  ;;  %v119_v45 = vsub.s32 2, %v110_v44 }
 0x138   :  { %v455_v61 = vadd.f32 %v454_v60, %v328_v46  ;;  %v456_v62 = vpop.f32.mrb[6].mxu0  ;;  %v493_v43 = vpop.f32.mrb[4].mxu1 }
 0x139   :  { %v500_v0 = vadd.f32 %v453_v59, %v2592_v56  ;;  %v457_v42 = vpop.f32.mrb[7].mxu0  ;;  %v494_v48 = vadd.f32 %v493_v43, %v367_v50  ;;  %v495_v1 = vpop.f32.mrb[5].mxu1  ;;  %v2601_v57 = vrot.slane %v107_v51, %v119_v45  ;;  %v3054_v45 = vld [vmem:[#allocation11_spill] sm:$0xff] }
 0x13a   :  { %v501_v47 = vadd.f32 %v455_v61, %v2594_v58  ;;  %v496_v55 = vadd.f32 %v495_v1, %v369_v53  ;;  %v497_v49 = vpop.f32.mrb[6].mxu1 }
 0x13b   :  { %v1986_v54 = vmul.f32 -1.442695, %v500_v0  ;;  %v498_v52 = vpop.f32.mrb[7].mxu1  ;;  %v502_v60 = vadd.f32 %v494_v48, %v2601_v57  ;;  %v3053_v49 = vmov 0  }
 0x13c   :  { %v1987_v37 = vmul.f32 -1.442695, %v501_v47  ;;  %v503_v46 = vadd.f32 %v496_v55, %v2598_v33  ;;  %v529_v52 = vld [vmem:[#allocation3 + $0x4] sm:$0xf] }
 0x13d   :  { %2095 = vpow2.f32 %v1986_v54 }
 0x13e   :  { %2097 = vpow2.f32 %v1987_v37  ;;  %v1988_v59 = vmul.f32 -1.442695, %v503_v46  ;;  %v3055_v46 = vld [vmem:[#allocation13_spill] sm:$0xff] }
 0x140   :  { %2099 = vpow2.f32 %v1988_v59 }
 0x141   :  { %2101 = vtanh.f32 %v502_v60 }
 0x147   :  { %v2096_v61 = vpop.eup %2095 }
 0x148   :  { %v2098_v50 = vpop.eup %2097  ;;  %v507_v62 = vadd.f32 1.0, %v2096_v61 }
 0x149   :  { %v513_v1 = vadd.f32 1.0, %v2098_v50 }
 0x14a   :  { %2103 = vrcp.f32 %v507_v62  ;;  %v2100_v53 = vpop.eup %2099 }
 0x14b   :  { %2105 = vrcp.f32 %v513_v1  ;;  %v2102_v63 = vpop.eup %2101  ;;  %v520_v42 = vadd.f32 1.0, %v2100_v53 }
 0x14d   :  { %2107 = vrcp.f32 %v520_v42 }
 0x154   :  { %v2104_v0 = vpop.eup %2103 }
 0x155   :  { %v2106_v44 = vpop.eup %2105  ;;  %v523_v37 = vmul.f32 0.0, %v2104_v0 }
 0x156   :  { %v524_v43 = vmul.f32 %v2106_v44, %v2102_v63 }
 0x157   :  { %v2108_v47 = vpop.eup %2107 }
 0x158   :  { %v2604_v51 = vadd.f32 %v524_v43, %v523_v37 }
 0x15a   :  { %2109 = vtanh.f32 %v2604_v51 }
 0x164   :  { %v2110_v48 = vpop.eup %2109 }
 0x165   :  { %v527_v54 = vmul.f32 %v2110_v48, %v2108_v47 }
 0x167   :  { %v530_v55 = vpack.c.bf16 %v527_v54, %v527_v54 }
 0x169   :  { %564 = vmatmul.mubr.bf16.vlgmr.msra.gmra.mrb[8].mxu0 %v530_v55  ;;  %605 = vmatmul.mubr.bf16.vlgmr.msra.gmra.mrb[8].mxu1 %v530_v55 }
 0x16a   :  { %617 = vmatpush1.bf16.msra.mxu0 %v2523_v35  ;;  %658 = vmatpush1.bf16.msra.mxu1 %v2533_v38 }
 0x16b   :  { %618 = vmatprep.subr.bf16.mxu0 %v2527_v36  ;;  %659 = vmatprep.subr.bf16.mxu1 %v2539_v40 }
 0x16c   :  { %648 = vmatprep.mubr.bf16.mxu0 %v3053_v49  ;;  %689 = vmatprep.mubr.bf16.mxu1 %v3053_v49 }
 0x16e   :  { %619 = vmatpush1.bf16.msra.mxu0 %v2536_v39  ;;  %660 = vmatpush1.bf16.msra.mxu1 %v2545_v41 }
 0x16f   :  { %729 = vmatprep.subr.bf16.mxu0 %v2427_v2  ;;  %770 = vmatprep.subr.bf16.mxu1 %v2437_v6 }
 0x171   :  { %1989 = vmatmul.mubr.msk.bf16.vlgmr.msra.gmra.mrb[12].mxu0 %vm414_vm0, %v529_v52  ;;  %1990 = vmatmul.mubr.msk.bf16.vlgmr.msra.gmra.mrb[12].mxu1 %vm414_vm0, %v529_v52 }
 0x172   :  { %730 = vmatpush1.bf16.msra.mxu0 %v2429_v3  ;;  %771 = vmatpush1.bf16.msra.mxu1 %v2442_v8 }
 0x173   :  { %731 = vmatprep.subr.bf16.mxu0 %v2432_v4  ;;  %772 = vmatprep.subr.bf16.mxu1 %v2446_v9 }
 0x174   :  { %761 = vmatprep.mubr.bf16.mxu0 %v3053_v49  ;;  %802 = vmatprep.mubr.bf16.mxu1 %v3053_v49 }
 0x176   :  { %732 = vmatpush1.bf16.msra.mxu0 %v2434_v5  ;;  %773 = vmatpush1.bf16.msra.mxu1 %v2453_v12 }
 0x177   :  { %733 = vmatprep.subr.bf16.mxu0 %v2440_v7  ;;  %774 = vmatprep.subr.bf16.mxu1 %v2457_v13 }
 0x17a   :  { %734 = vmatpush1.bf16.msra.mxu0 %v2449_v10  ;;  %775 = vmatpush1.bf16.msra.mxu1 %v2462_v15 }
 0x17b   :  { %735 = vmatprep.subr.bf16.mxu0 %v2451_v11  ;;  %776 = vmatprep.subr.bf16.mxu1 %v2466_v16 }
 0x17e   :  { %736 = vmatpush1.bf16.msra.mxu0 %v2460_v14  ;;  %777 = vmatpush1.bf16.msra.mxu1 %v2472_v18 }
 0x17f   :  { %737 = vmatprep.subr.bf16.mxu0 %v2469_v17  ;;  %778 = vmatprep.subr.bf16.mxu1 %v2478_v20 }
 0x182   :  { %738 = vmatpush1.bf16.msra.mxu0 %v2475_v19  ;;  %779 = vmatpush1.bf16.msra.mxu1 %v2484_v22 }
 0x183   :  { %739 = vmatprep.subr.bf16.mxu0 %v2481_v21  ;;  %780 = vmatprep.subr.bf16.mxu1 %v2490_v24 }
 0x186   :  { %740 = vmatpush1.bf16.msra.mxu0 %v2487_v23  ;;  %781 = vmatpush1.bf16.msra.mxu1 %v2496_v26 }
 0x187   :  { %741 = vmatprep.subr.bf16.mxu0 %v2493_v25  ;;  %782 = vmatprep.subr.bf16.mxu1 %v2502_v28 }
 0x18a   :  { %742 = vmatpush1.bf16.msra.mxu0 %v2499_v27  ;;  %783 = vmatpush1.bf16.msra.mxu1 %v2508_v30 }
 0x18b   :  { %743 = vmatprep.subr.bf16.mxu0 %v2505_v29  ;;  %784 = vmatprep.subr.bf16.mxu1 %v2514_v32 }
 0x18e   :  { %744 = vmatpush1.bf16.msra.mxu0 %v2511_v31  ;;  %785 = vmatpush1.bf16.msra.mxu1 %v2520_v34 }
 0x18f   :  { %814 = vmatprep.subr.bf16.mxu0 %v3054_v45  ;;  %855 = vmatprep.subr.bf16.mxu1 %v3055_v46 }
 0x23c   :  { %v565_v59 = vpop.f32.mrb[8].mxu0  ;;  %v606_v60 = vpop.f32.mrb[8].mxu1 }
 0x23d   :  { %v567_v61 = vpop.f32.mrb[9].mxu0  ;;  %v608_v50 = vpop.f32.mrb[9].mxu1 }
 0x23e   :  { %v569_v62 = vpop.f32.mrb[10].mxu0  ;;  %v610_v1 = vpop.f32.mrb[10].mxu1 }
 0x23f   :  { %v570_v53 = vpop.f32.mrb[11].mxu0  ;;  %v611_v63 = vpop.f32.mrb[11].mxu1 }
 0x244   :  { %v650_v0 = vpop.f32.mrb[12].mxu0  ;;  %v691_v44 = vpop.f32.mrb[12].mxu1 }
 0x245   :  { %v651_v37 = vadd.f32 %v650_v0, %v565_v59  ;;  %v692_v42 = vadd.f32 %v691_v44, %v606_v60  ;;  %v652_v43 = vpop.f32.mrb[13].mxu0  ;;  %v693_v47 = vpop.f32.mrb[13].mxu1 }
 0x246   :  { %v653_v48 = vadd.f32 %v652_v43, %v567_v61  ;;  %v694_v54 = vadd.f32 %v693_v47, %v608_v50  ;;  %v654_v55 = vpop.f32.mrb[14].mxu0  ;;  %v695_v52 = vpop.f32.mrb[14].mxu1 }
 0x247   :  { %v698_v46 = vadd.f32 %v651_v37, %v2592_v56  ;;  %v655_v45 = vpop.f32.mrb[15].mxu0  ;;  %v696_v34 = vpop.f32.mrb[15].mxu1  ;;  %v700_v60 = vadd.f32 %v692_v42, %v2601_v57  ;;  %v3056_v52 = vld [vmem:[#allocation10_spill] sm:$0xff] }
 0x248   :  { %v699_v31 = vadd.f32 %v653_v48, %v2594_v58  ;;  %v701_v53 = vadd.f32 %v694_v54, %v2598_v33 }
 0x249   :  { %v1991_v62 = vmul.f32 -1.442695, %v698_v46 }
 0x24a   :  { %v1992_v1 = vmul.f32 -1.442695, %v699_v31  ;;  %v1993_v59 = vmul.f32 -1.442695, %v701_v53  ;;  %v3059_v53 = vld [vmem:[#allocation13_spill] sm:$0xff] }
 0x24b   :  { %2111 = vpow2.f32 %v1991_v62  ;;  %v3057_v62 = vld [vmem:[#allocation12_spill] sm:$0xff] }
 0x24c   :  { %2113 = vpow2.f32 %v1992_v1  ;;  %v3058_v1 = vld [vmem:[#allocation11_spill] sm:$0xff] }
 0x24d   :  { %2115 = vpow2.f32 %v1993_v59 }
 0x24e   :  { %2117 = vtanh.f32 %v700_v60 }
 0x255   :  { %v2112_v63 = vpop.eup %2111 }
 0x256   :  { %v2114_v61 = vpop.eup %2113  ;;  %v705_v50 = vadd.f32 1.0, %v2112_v63 }
 0x257   :  { %v711_v0 = vadd.f32 1.0, %v2114_v61  ;;  %v2116_v34 = vpop.eup %2115 }
 0x258   :  { %2119 = vrcp.f32 %v705_v50  ;;  %v2118_v45 = vpop.eup %2117  ;;  %v718_v37 = vadd.f32 1.0, %v2116_v34 }
 0x259   :  { %2121 = vrcp.f32 %v711_v0 }
 0x25a   :  { %2123 = vrcp.f32 %v718_v37 }
 0x262   :  { %v2120_v44 = vpop.eup %2119 }
 0x263   :  { %v2122_v46 = vpop.eup %2121  ;;  %v721_v31 = vmul.f32 %v2120_v44, %v2604_v51  ;;  %v727_v51 = vld [vmem:[#allocation3 + $0x8] sm:$0xf] }
 0x264   :  { %v722_v43 = vmul.f32 %v2122_v46, %v2118_v45  ;;  %v2124_v42 = vpop.eup %2123 }
 0x266   :  { %v2658_v47 = vadd.f32 %v722_v43, %v721_v31 }
 0x268   :  { %2125 = vtanh.f32 %v2658_v47 }
 0x272   :  { %v2126_v48 = vpop.eup %2125 }
 0x273   :  { %v725_v54 = vmul.f32 %v2126_v48, %v2124_v42 }
 0x275   :  { %v728_v55 = vpack.c.bf16 %v725_v54, %v725_v54 }
 0x277   :  { %762 = vmatmul.mubr.bf16.vlgmr.msra.gmra.mrb[16].mxu0 %v728_v55  ;;  %803 = vmatmul.mubr.bf16.vlgmr.msra.gmra.mrb[16].mxu1 %v728_v55 }
 0x278   :  { %815 = vmatpush1.bf16.msra.mxu0 %v2523_v35  ;;  %856 = vmatpush1.bf16.msra.mxu1 %v2533_v38 }
 0x279   :  { %816 = vmatprep.subr.bf16.mxu0 %v2527_v36  ;;  %857 = vmatprep.subr.bf16.mxu1 %v2539_v40 }
 0x27a   :  { %846 = vmatprep.mubr.bf16.mxu0 %v3053_v49  ;;  %887 = vmatprep.mubr.bf16.mxu1 %v3053_v49 }
 0x27c   :  { %817 = vmatpush1.bf16.msra.mxu0 %v2536_v39  ;;  %858 = vmatpush1.bf16.msra.mxu1 %v2545_v41 }
 0x27d   :  { %927 = vmatprep.subr.bf16.mxu0 %v2427_v2  ;;  %968 = vmatprep.subr.bf16.mxu1 %v2437_v6 }
 0x27f   :  { %1994 = vmatmul.mubr.msk.bf16.vlgmr.msra.gmra.mrb[20].mxu0 %vm414_vm0, %v727_v51  ;;  %1995 = vmatmul.mubr.msk.bf16.vlgmr.msra.gmra.mrb[20].mxu1 %vm414_vm0, %v727_v51 }
 0x280   :  { %928 = vmatpush1.bf16.msra.mxu0 %v2429_v3  ;;  %969 = vmatpush1.bf16.msra.mxu1 %v2442_v8 }
 0x281   :  { %929 = vmatprep.subr.bf16.mxu0 %v2432_v4  ;;  %970 = vmatprep.subr.bf16.mxu1 %v2446_v9 }
 0x282   :  { %959 = vmatprep.mubr.bf16.mxu0 %v3053_v49  ;;  %1000 = vmatprep.mubr.bf16.mxu1 %v3053_v49 }
 0x284   :  { %930 = vmatpush1.bf16.msra.mxu0 %v2434_v5  ;;  %971 = vmatpush1.bf16.msra.mxu1 %v2453_v12 }
 0x285   :  { %931 = vmatprep.subr.bf16.mxu0 %v2440_v7  ;;  %972 = vmatprep.subr.bf16.mxu1 %v2457_v13 }
 0x288   :  { %932 = vmatpush1.bf16.msra.mxu0 %v2449_v10  ;;  %973 = vmatpush1.bf16.msra.mxu1 %v2462_v15 }
 0x289   :  { %933 = vmatprep.subr.bf16.mxu0 %v2451_v11  ;;  %974 = vmatprep.subr.bf16.mxu1 %v2466_v16 }
 0x28c   :  { %934 = vmatpush1.bf16.msra.mxu0 %v2460_v14  ;;  %975 = vmatpush1.bf16.msra.mxu1 %v2472_v18 }
 0x28d   :  { %935 = vmatprep.subr.bf16.mxu0 %v2469_v17  ;;  %976 = vmatprep.subr.bf16.mxu1 %v2478_v20 }
 0x290   :  { %936 = vmatpush1.bf16.msra.mxu0 %v2475_v19  ;;  %977 = vmatpush1.bf16.msra.mxu1 %v2484_v22 }
 0x291   :  { %937 = vmatprep.subr.bf16.mxu0 %v2481_v21  ;;  %978 = vmatprep.subr.bf16.mxu1 %v2490_v24 }
 0x294   :  { %938 = vmatpush1.bf16.msra.mxu0 %v2487_v23  ;;  %979 = vmatpush1.bf16.msra.mxu1 %v2496_v26 }
 0x295   :  { %939 = vmatprep.subr.bf16.mxu0 %v2493_v25  ;;  %980 = vmatprep.subr.bf16.mxu1 %v2502_v28 }
 0x298   :  { %940 = vmatpush1.bf16.msra.mxu0 %v2499_v27  ;;  %981 = vmatpush1.bf16.msra.mxu1 %v2508_v30 }
 0x299   :  { %941 = vmatprep.subr.bf16.mxu0 %v2505_v29  ;;  %982 = vmatprep.subr.bf16.mxu1 %v2514_v32 }
 0x29c   :  { %942 = vmatpush1.bf16.msra.mxu0 %v3056_v52  ;;  %983 = vmatpush1.bf16.msra.mxu1 %v3057_v62 }
 0x29d   :  { %1012 = vmatprep.subr.bf16.mxu0 %v3058_v1  ;;  %1053 = vmatprep.subr.bf16.mxu1 %v3059_v53 }
 0x34a   :  { %v763_v59 = vpop.f32.mrb[16].mxu0  ;;  %v804_v60 = vpop.f32.mrb[16].mxu1 }
 0x34b   :  { %v765_v63 = vpop.f32.mrb[17].mxu0  ;;  %v806_v61 = vpop.f32.mrb[17].mxu1 }
 0x34c   :  { %v767_v50 = vpop.f32.mrb[18].mxu0  ;;  %v808_v0 = vpop.f32.mrb[18].mxu1 }
 0x34d   :  { %v768_v34 = vpop.f32.mrb[19].mxu0  ;;  %v809_v45 = vpop.f32.mrb[19].mxu1 }
 0x352   :  { %v848_v44 = vpop.f32.mrb[20].mxu0  ;;  %v889_v46 = vpop.f32.mrb[20].mxu1 }
 0x353   :  { %v849_v31 = vadd.f32 %v848_v44, %v763_v59  ;;  %v890_v37 = vadd.f32 %v889_v46, %v804_v60  ;;  %v850_v43 = vpop.f32.mrb[21].mxu0  ;;  %v891_v42 = vpop.f32.mrb[21].mxu1 }
 0x354   :  { %v851_v48 = vadd.f32 %v850_v43, %v765_v63  ;;  %v892_v54 = vadd.f32 %v891_v42, %v806_v61  ;;  %v852_v55 = vpop.f32.mrb[22].mxu0  ;;  %v893_v51 = vpop.f32.mrb[22].mxu1 }
 0x355   :  { %v896_v53 = vadd.f32 %v849_v31, %v2592_v56  ;;  %v853_v1 = vpop.f32.mrb[23].mxu0  ;;  %v894_v62 = vpop.f32.mrb[23].mxu1  ;;  %v898_v60 = vadd.f32 %v890_v37, %v2601_v57 }
 0x356   :  { %v897_v52 = vadd.f32 %v851_v48, %v2594_v58  ;;  %v899_v34 = vadd.f32 %v892_v54, %v2598_v33 }
 0x357   :  { %v1996_v50 = vmul.f32 -1.442695, %v896_v53 }
 0x358   :  { %v1997_v0 = vmul.f32 -1.442695, %v897_v52  ;;  %v1998_v59 = vmul.f32 -1.442695, %v899_v34 }
 0x359   :  { %2127 = vpow2.f32 %v1996_v50 }
 0x35a   :  { %2129 = vpow2.f32 %v1997_v0 }
 0x35b   :  { %2131 = vpow2.f32 %v1998_v59 }
 0x35c   :  { %2133 = vtanh.f32 %v898_v60 }
 0x363   :  { %v2128_v45 = vpop.eup %2127 }
 0x364   :  { %v2130_v63 = vpop.eup %2129  ;;  %v903_v61 = vadd.f32 1.0, %v2128_v45 }
 0x365   :  { %v909_v44 = vadd.f32 1.0, %v2130_v63  ;;  %v2132_v62 = vpop.eup %2131 }
 0x366   :  { %2135 = vrcp.f32 %v903_v61  ;;  %v2134_v1 = vpop.eup %2133  ;;  %v916_v31 = vadd.f32 1.0, %v2132_v62 }
 0x367   :  { %2137 = vrcp.f32 %v909_v44 }
 0x368   :  { %2139 = vrcp.f32 %v916_v31 }
 0x370   :  { %v2136_v46 = vpop.eup %2135 }
 0x371   :  { %v2138_v53 = vpop.eup %2137  ;;  %v919_v52 = vmul.f32 %v2136_v46, %v2658_v47  ;;  %v925_v47 = vld [vmem:[#allocation3 + $0xc] sm:$0xf] }
 0x372   :  { %v920_v43 = vmul.f32 %v2138_v53, %v2134_v1  ;;  %v2140_v37 = vpop.eup %2139 }
 0x374   :  { %v2712_v42 = vadd.f32 %v920_v43, %v919_v52 }
 0x376   :  { %2141 = vtanh.f32 %v2712_v42 }
 0x380   :  { %v2142_v48 = vpop.eup %2141 }
 0x381   :  { %v923_v54 = vmul.f32 %v2142_v48, %v2140_v37 }
 0x383   :  { %v926_v55 = vpack.c.bf16 %v923_v54, %v923_v54 }
 0x385   :  { %960 = vmatmul.mubr.bf16.vlgmr.msra.gmra.mrb[24].mxu0 %v926_v55  ;;  %1001 = vmatmul.mubr.bf16.vlgmr.msra.gmra.mrb[24].mxu1 %v926_v55 }
 0x386   :  { %1013 = vmatpush1.bf16.msra.mxu0 %v2523_v35  ;;  %1054 = vmatpush1.bf16.msra.mxu1 %v2533_v38 }
 0x387   :  { %1014 = vmatprep.subr.bf16.mxu0 %v2527_v36  ;;  %1055 = vmatprep.subr.bf16.mxu1 %v2539_v40 }
 0x388   :  { %1044 = vmatprep.mubr.bf16.mxu0 %v3053_v49  ;;  %1085 = vmatprep.mubr.bf16.mxu1 %v3053_v49 }
 0x38a   :  { %1015 = vmatpush1.bf16.msra.mxu0 %v2536_v39  ;;  %1056 = vmatpush1.bf16.msra.mxu1 %v2545_v41 }
 0x38b   :  { %1125 = vmatprep.subr.bf16.mxu0 %v2427_v2  ;;  %1166 = vmatprep.subr.bf16.mxu1 %v2437_v6  ;;  %v3060_v2 = vld [vmem:[#allocation10_spill] sm:$0xff] }
 0x38d   :  { %1999 = vmatmul.mubr.msk.bf16.vlgmr.msra.gmra.mrb[28].mxu0 %vm414_vm0, %v925_v47  ;;  %2000 = vmatmul.mubr.msk.bf16.vlgmr.msra.gmra.mrb[28].mxu1 %vm414_vm0, %v925_v47 }
 0x38e   :  { %1126 = vmatpush1.bf16.msra.mxu0 %v2429_v3  ;;  %1167 = vmatpush1.bf16.msra.mxu1 %v2442_v8  ;;  %v3061_v3 = vld [vmem:[#allocation12_spill] sm:$0xff] }
 0x38f   :  { %1127 = vmatprep.subr.bf16.mxu0 %v2432_v4  ;;  %1168 = vmatprep.subr.bf16.mxu1 %v2446_v9  ;;  %v3062_v4 = vld [vmem:[#allocation11_spill] sm:$0xff] }
 0x390   :  { %1157 = vmatprep.mubr.bf16.mxu0 %v3053_v49  ;;  %1198 = vmatprep.mubr.bf16.mxu1 %v3053_v49 }
 0x392   :  { %1128 = vmatpush1.bf16.msra.mxu0 %v2434_v5  ;;  %1169 = vmatpush1.bf16.msra.mxu1 %v2453_v12  ;;  %v3063_v5 = vld [vmem:[#allocation13_spill] sm:$0xff] }
 0x393   :  { %1129 = vmatprep.subr.bf16.mxu0 %v2440_v7  ;;  %1170 = vmatprep.subr.bf16.mxu1 %v2457_v13 }
 0x396   :  { %1130 = vmatpush1.bf16.msra.mxu0 %v2449_v10  ;;  %1171 = vmatpush1.bf16.msra.mxu1 %v2462_v15 }
 0x397   :  { %1131 = vmatprep.subr.bf16.mxu0 %v2451_v11  ;;  %1172 = vmatprep.subr.bf16.mxu1 %v2466_v16 }
 0x39a   :  { %1132 = vmatpush1.bf16.msra.mxu0 %v2460_v14  ;;  %1173 = vmatpush1.bf16.msra.mxu1 %v2472_v18 }
 0x39b   :  { %1133 = vmatprep.subr.bf16.mxu0 %v2469_v17  ;;  %1174 = vmatprep.subr.bf16.mxu1 %v2478_v20 }
 0x39e   :  { %1134 = vmatpush1.bf16.msra.mxu0 %v2475_v19  ;;  %1175 = vmatpush1.bf16.msra.mxu1 %v2484_v22 }
 0x39f   :  { %1135 = vmatprep.subr.bf16.mxu0 %v2481_v21  ;;  %1176 = vmatprep.subr.bf16.mxu1 %v2490_v24 }
 0x3a2   :  { %1136 = vmatpush1.bf16.msra.mxu0 %v2487_v23  ;;  %1177 = vmatpush1.bf16.msra.mxu1 %v2496_v26 }
 0x3a3   :  { %1137 = vmatprep.subr.bf16.mxu0 %v2493_v25  ;;  %1178 = vmatprep.subr.bf16.mxu1 %v2502_v28 }
 0x3a6   :  { %1138 = vmatpush1.bf16.msra.mxu0 %v2499_v27  ;;  %1179 = vmatpush1.bf16.msra.mxu1 %v2508_v30 }
 0x3a7   :  { %1139 = vmatprep.subr.bf16.mxu0 %v2505_v29  ;;  %1180 = vmatprep.subr.bf16.mxu1 %v2514_v32 }
 0x3aa   :  { %1140 = vmatpush1.bf16.msra.mxu0 %v3060_v2  ;;  %1181 = vmatpush1.bf16.msra.mxu1 %v3061_v3 }
 0x3ab   :  { %1210 = vmatprep.subr.bf16.mxu0 %v3062_v4  ;;  %1251 = vmatprep.subr.bf16.mxu1 %v3063_v5 }
 0x458   :  { %v961_v6 = vpop.f32.mrb[24].mxu0  ;;  %v1002_v7 = vpop.f32.mrb[24].mxu1 }
 0x459   :  { %v963_v8 = vpop.f32.mrb[25].mxu0  ;;  %v1004_v9 = vpop.f32.mrb[25].mxu1 }
 0x45a   :  { %v965_v10 = vpop.f32.mrb[26].mxu0  ;;  %v1006_v11 = vpop.f32.mrb[26].mxu1 }
 0x45b   :  { %v966_v12 = vpop.f32.mrb[27].mxu0  ;;  %v1007_v13 = vpop.f32.mrb[27].mxu1 }
 0x460   :  { %v1046_v14 = vpop.f32.mrb[28].mxu0  ;;  %v1087_v15 = vpop.f32.mrb[28].mxu1 }
 0x461   :  { %v1047_v51 = vadd.f32 %v1046_v14, %v961_v6  ;;  %v1088_v50 = vadd.f32 %v1087_v15, %v1002_v7  ;;  %v1048_v0 = vpop.f32.mrb[29].mxu0  ;;  %v1089_v34 = vpop.f32.mrb[29].mxu1 }
 0x462   :  { %v1049_v59 = vadd.f32 %v1048_v0, %v963_v8  ;;  %v1090_v60 = vadd.f32 %v1089_v34, %v1004_v9  ;;  %v1050_v45 = vpop.f32.mrb[30].mxu0  ;;  %v1091_v63 = vpop.f32.mrb[30].mxu1  ;;  %v2802_v0 = vld [vmem:[#allocation7 + $0x28] ss:$16 sps:$4 sm:$0xff]   ;;  %v2805_v34 = vld [vmem:[#allocation7 + $0x44] ss:$16 sps:$4 sm:$0xff]  }
 0x463   :  { %v1094_v61 = vadd.f32 %v1047_v51, %v2592_v56  ;;  %v1051_v44 = vpop.f32.mrb[31].mxu0  ;;  %v1092_v62 = vpop.f32.mrb[31].mxu1  ;;  %v1096_v43 = vadd.f32 %v1088_v50, %v2601_v57  ;;  %v2777_v50 = vld [vmem:[#allocation7 + $0x4] ss:$16 sps:$4 sm:$0xff]   ;;  %v2814_v45 = vld [vmem:[#allocation7 + $0x48] ss:$16 sps:$4 sm:$0xff]  }
 0x464   :  { %v1095_v1 = vadd.f32 %v1049_v59, %v2594_v58  ;;  %v1097_v52 = vadd.f32 %v1090_v60, %v2598_v33  ;;  %v2808_v59 = vld [vmem:[#allocation7 + $0x4c] ss:$16 sps:$4 sm:$0xff]   ;;  %v2811_v60 = vld [vmem:[#allocation7 + $0x40] ss:$16 sps:$4 sm:$0xff]   ;;  %v2817_v63 = vld [vmem:[#allocation7 + $0x64] ss:$16 sps:$4 sm:$0xff]  }
 0x465   :  { %v2001_v46 = vmul.f32 -1.442695, %v1094_v61  ;;  %v2821_v61 = vld [vmem:[#allocation7 + $0x60] ss:$16 sps:$4 sm:$0xff]  }
 0x466   :  { %v2002_v53 = vmul.f32 -1.442695, %v1095_v1  ;;  %v2003_v31 = vmul.f32 -1.442695, %v1097_v52 }
 0x467   :  { %2143 = vpow2.f32 %v2001_v46 }
 0x468   :  { %2145 = vpow2.f32 %v2002_v53 }
 0x469   :  { %2147 = vpow2.f32 %v2003_v31 }
 0x46a   :  { %2149 = vtanh.f32 %v1096_v43 }
 0x471   :  { %v2144_v37 = vpop.eup %2143 }
 0x472   :  { %v2146_v48 = vpop.eup %2145  ;;  %v1101_v54 = vadd.f32 1.0, %v2144_v37 }
 0x473   :  { %v1107_v55 = vadd.f32 1.0, %v2146_v48  ;;  %v2148_v47 = vpop.eup %2147 }
 0x474   :  { %2151 = vrcp.f32 %v1101_v54  ;;  %v2150_v6 = vpop.eup %2149  ;;  %v1114_v10 = vadd.f32 1.0, %v2148_v47 }
 0x475   :  { %2153 = vrcp.f32 %v1107_v55 }
 0x476   :  { %2155 = vrcp.f32 %v1114_v10 }
 0x47e   :  { %v2152_v7 = vpop.eup %2151 }
 0x47f   :  { %v2154_v8 = vpop.eup %2153  ;;  %v1117_v9 = vmul.f32 %v2152_v7, %v2712_v42  ;;  %v1123_v42 = vld [vmem:[#allocation3 + $0x10] sm:$0xf] }
 0x480   :  { %v1118_v11 = vmul.f32 %v2154_v8, %v2150_v6  ;;  %v2156_v13 = vpop.eup %2155 }
 0x482   :  { %v2766_v12 = vadd.f32 %v1118_v11, %v1117_v9 }
 0x484   :  { %2157 = vtanh.f32 %v2766_v12 }
 0x48e   :  { %v2158_v14 = vpop.eup %2157 }
 0x48f   :  { %v1121_v15 = vmul.f32 %v2158_v14, %v2156_v13 }
 0x491   :  { %v1124_v51 = vpack.c.bf16 %v1121_v15, %v1121_v15 }
 0x493   :  { %1158 = vmatmul.mubr.bf16.vlgmr.msra.gmra.mrb[32].mxu0 %v1124_v51  ;;  %1199 = vmatmul.mubr.bf16.vlgmr.msra.gmra.mrb[32].mxu1 %v1124_v51 }
 0x494   :  { %1211 = vmatpush1.bf16.msra.mxu0 %v2523_v35  ;;  %1252 = vmatpush1.bf16.msra.mxu1 %v2533_v38  ;;  %v2780_v35 = vld [vmem:[#allocation7 + $0xc] ss:$16 sps:$4 sm:$0xff]   ;;  %v2788_v38 = vld [vmem:[#allocation7 + $0x8] ss:$16 sps:$4 sm:$0xff]  }
 0x495   :  { %1212 = vmatprep.subr.bf16.mxu0 %v2527_v36  ;;  %1253 = vmatprep.subr.bf16.mxu1 %v2539_v40  ;;  %v2785_v36 = vld [vmem:[#allocation7] ss:$16 sps:$4 sm:$0xff]   ;;  %v2794_v40 = vld [vmem:[#allocation7 + $0x2c] ss:$16 sps:$4 sm:$0xff]  }
 0x496   :  { %1242 = vmatprep.mubr.bf16.mxu0 %v3053_v49  ;;  %1283 = vmatprep.mubr.bf16.mxu1 %v3053_v49 }
 0x498   :  { %1213 = vmatpush1.bf16.msra.mxu0 %v2536_v39  ;;  %1254 = vmatpush1.bf16.msra.mxu1 %v2545_v41  ;;  %v2791_v39 = vld [vmem:[#allocation7 + $0x24] ss:$16 sps:$4 sm:$0xff]   ;;  %v2799_v41 = vld [vmem:[#allocation7 + $0x20] ss:$16 sps:$4 sm:$0xff]  }
 0x499   :  { %1323 = vmatprep.subr.bf16.mxu0 %v2777_v50  ;;  %1364 = vmatprep.subr.bf16.mxu1 %v2780_v35 }
 0x49b   :  { %2004 = vmatmul.mubr.msk.bf16.vlgmr.msra.gmra.mrb[36].mxu0 %vm414_vm0, %v1123_v42  ;;  %2005 = vmatmul.mubr.msk.bf16.vlgmr.msra.gmra.mrb[36].mxu1 %vm414_vm0, %v1123_v42  ;;  %v2851_v42 = vld [vmem:[#allocation5] ss:$16 sps:$4 sm:$0xff]  }
 0x49c   :  { %1324 = vmatpush1.bf16.msra.mxu0 %v2785_v36  ;;  %1365 = vmatpush1.bf16.msra.mxu1 %v2788_v38 }
 0x49d   :  { %1325 = vmatprep.subr.bf16.mxu0 %v2791_v39  ;;  %1366 = vmatprep.subr.bf16.mxu1 %v2794_v40 }
 0x49e   :  { %1355 = vmatprep.mubr.bf16.mxu0 %v3053_v49  ;;  %1396 = vmatprep.mubr.bf16.mxu1 %v3053_v49 }
 0x4a0   :  { %1326 = vmatpush1.bf16.msra.mxu0 %v2799_v41  ;;  %1367 = vmatpush1.bf16.msra.mxu1 %v2802_v0 }
 0x4a1   :  { %1327 = vmatprep.subr.bf16.mxu0 %v2805_v34  ;;  %1368 = vmatprep.subr.bf16.mxu1 %v2808_v59 }
 0x4a4   :  { %1328 = vmatpush1.bf16.msra.mxu0 %v2811_v60  ;;  %1369 = vmatpush1.bf16.msra.mxu1 %v2814_v45 }
 0x4a5   :  { %1329 = vmatprep.subr.bf16.mxu0 %v2817_v63  ;;  %1370 = vmatprep.subr.bf16.mxu1 %v2466_v16 }
 0x4a8   :  { %1330 = vmatpush1.bf16.msra.mxu0 %v2821_v61  ;;  %1371 = vmatpush1.bf16.msra.mxu1 %v2472_v18 }
 0x4a9   :  { %1331 = vmatprep.subr.bf16.mxu0 %v2469_v17  ;;  %1372 = vmatprep.subr.bf16.mxu1 %v2478_v20 }
 0x4ac   :  { %1332 = vmatpush1.bf16.msra.mxu0 %v2475_v19  ;;  %1373 = vmatpush1.bf16.msra.mxu1 %v2484_v22 }
 0x4ad   :  { %1333 = vmatprep.subr.bf16.mxu0 %v2481_v21  ;;  %1374 = vmatprep.subr.bf16.mxu1 %v2490_v24 }
 0x4b0   :  { %1334 = vmatpush1.bf16.msra.mxu0 %v2487_v23  ;;  %1375 = vmatpush1.bf16.msra.mxu1 %v2496_v26 }
 0x4b1   :  { %1335 = vmatprep.subr.bf16.mxu0 %v2493_v25  ;;  %1376 = vmatprep.subr.bf16.mxu1 %v2502_v28 }
 0x4b4   :  { %1336 = vmatpush1.bf16.msra.mxu0 %v2499_v27  ;;  %1377 = vmatpush1.bf16.msra.mxu1 %v2508_v30 }
 0x4b5   :  { %1337 = vmatprep.subr.bf16.mxu0 %v2505_v29  ;;  %1378 = vmatprep.subr.bf16.mxu1 %v2514_v32 }
 0x4b8   :  { %1338 = vmatpush1.bf16.msra.mxu0 %v3060_v2  ;;  %1379 = vmatpush1.bf16.msra.mxu1 %v3061_v3 }
 0x4b9   :  { %1408 = vmatprep.subr.bf16.mxu0 %v3062_v4  ;;  %1449 = vmatprep.subr.bf16.mxu1 %v3063_v5 }
 0x566   :  { %v1159_v16 = vpop.f32.mrb[32].mxu0  ;;  %v1200_v17 = vpop.f32.mrb[32].mxu1 }
 0x567   :  { %v1161_v18 = vpop.f32.mrb[33].mxu0  ;;  %v1202_v19 = vpop.f32.mrb[33].mxu1 }
 0x568   :  { %v1163_v20 = vpop.f32.mrb[34].mxu0  ;;  %v1204_v21 = vpop.f32.mrb[34].mxu1 }
 0x569   :  { %v1164_v22 = vpop.f32.mrb[35].mxu0  ;;  %v1205_v23 = vpop.f32.mrb[35].mxu1  ;;  %v1321_v20 = vld [vmem:[#allocation3 + $0x14] sm:$0xf]  ;;  %v2888_v21 = vld [vmem:[#allocation7 + $0x6c] ss:$16 sps:$4 sm:$0xff]  }
 0x56a   :  { %v2892_v22 = vld [vmem:[#allocation7 + $0x68] ss:$16 sps:$4 sm:$0xff]   ;;  %v2895_v23 = vld [vmem:[#allocation7 + $0x84] ss:$16 sps:$4 sm:$0xff]  }
 0x56e   :  { %v1244_v24 = vpop.f32.mrb[36].mxu0  ;;  %v1285_v25 = vpop.f32.mrb[36].mxu1 }
 0x56f   :  { %v1245_v26 = vadd.f32 %v1244_v24, %v1159_v16  ;;  %v1286_v27 = vadd.f32 %v1285_v25, %v1200_v17  ;;  %v1246_v28 = vpop.f32.mrb[37].mxu0  ;;  %v1287_v29 = vpop.f32.mrb[37].mxu1  ;;  %v2854_v16 = vld [vmem:[#allocation5 + $0x8] ss:$16 sps:$4 sm:$0xff]   ;;  %v2860_v17 = vld [vmem:[#allocation5 + $0x2c] ss:$16 sps:$4 sm:$0xff]  }
 0x570   :  { %v1247_v30 = vadd.f32 %v1246_v28, %v1161_v18  ;;  %v1288_v32 = vadd.f32 %v1287_v29, %v1202_v19  ;;  %v1248_v2 = vpop.f32.mrb[38].mxu0  ;;  %v1289_v3 = vpop.f32.mrb[38].mxu1  ;;  %v2865_v18 = vld [vmem:[#allocation5 + $0x20] ss:$16 sps:$4 sm:$0xff]   ;;  %v2868_v19 = vld [vmem:[#allocation5 + $0x28] ss:$16 sps:$4 sm:$0xff]  }
 0x571   :  { %v1292_v4 = vadd.f32 %v1245_v26, %v2592_v56  ;;  %v1249_v5 = vpop.f32.mrb[39].mxu0  ;;  %v1290_v44 = vpop.f32.mrb[39].mxu1  ;;  %v1294_v31 = vadd.f32 %v1286_v27, %v2601_v57  ;;  %v2898_v24 = vld [vmem:[#allocation7 + $0x8c] ss:$16 sps:$4 sm:$0xff]   ;;  %v2901_v25 = vld [vmem:[#allocation7 + $0x80] ss:$16 sps:$4 sm:$0xff]  }
 0x572   :  { %v1293_v62 = vadd.f32 %v1247_v30, %v2594_v58  ;;  %v1295_v53 = vadd.f32 %v1288_v32, %v2598_v33  ;;  %v2904_v26 = vld [vmem:[#allocation7 + $0x88] ss:$16 sps:$4 sm:$0xff]   ;;  %v2907_v27 = vld [vmem:[#allocation7 + $0xa4] ss:$16 sps:$4 sm:$0xff]   ;;  %v2910_v28 = vld [vmem:[#allocation7 + $0xac] ss:$16 sps:$4 sm:$0xff]  }
 0x573   :  { %v2006_v1 = vmul.f32 -1.442695, %v1292_v4  ;;  %v2913_v29 = vld [vmem:[#allocation7 + $0xa0] ss:$16 sps:$4 sm:$0xff]   ;;  %v2916_v30 = vld [vmem:[#allocation7 + $0xa8] ss:$16 sps:$4 sm:$0xff]  }
 0x574   :  { %v2007_v46 = vmul.f32 -1.442695, %v1293_v62  ;;  %v2008_v52 = vmul.f32 -1.442695, %v1295_v53  ;;  %v2919_v32 = vld [vmem:[#allocation7 + $0xc4] ss:$16 sps:$4 sm:$0xff]  }
 0x575   :  { %2159 = vpow2.f32 %v2006_v1  ;;  %v2922_v2 = vld [vmem:[#allocation7 + $0xcc] ss:$16 sps:$4 sm:$0xff]   ;;  %v2925_v3 = vld [vmem:[#allocation7 + $0xc0] ss:$16 sps:$4 sm:$0xff]   ;;  %v2928_v4 = vld [vmem:[#allocation7 + $0xc8] ss:$16 sps:$4 sm:$0xff]  }
 0x576   :  { %2161 = vpow2.f32 %v2007_v46  ;;  %v2931_v5 = vld [vmem:[#allocation7 + $0xe4] ss:$16 sps:$4 sm:$0xff]   ;;  %v2934_v44 = vld [vmem:[#allocation7 + $0xec] ss:$16 sps:$4 sm:$0xff]   ;;  %v2937_v62 = vld [vmem:[#allocation7 + $0xe0] ss:$16 sps:$4 sm:$0xff]  }
 0x577   :  { %2163 = vpow2.f32 %v2008_v52  ;;  %3064 = vst [vmem:[#allocation10_spill] sm:$0xff] %v2937_v62  ;;  %v2940_v1 = vld [vmem:[#allocation7 + $0xe8] ss:$16 sps:$4 sm:$0xff]   ;;  %v2943_v46 = vld [vmem:[#allocation5 + $0x4] ss:$16 sps:$4 sm:$0xff]  }
 0x578   :  { %2165 = vtanh.f32 %v1294_v31  ;;  %3065 = vst [vmem:[#allocation12_spill] sm:$0xff] %v2940_v1  ;;  %3066 = vst [vmem:[#allocation11_spill] sm:$0xff] %v2943_v46  ;;  %v2946_v53 = vld [vmem:[#allocation5 + $0xc] ss:$16 sps:$4 sm:$0xff]  }
 0x579   :  { %3067 = vst [vmem:[#allocation13_spill] sm:$0xff] %v2946_v53 }
 0x57f   :  { %v2160_v43 = vpop.eup %2159 }
 0x580   :  { %v2162_v37 = vpop.eup %2161  ;;  %v1299_v48 = vadd.f32 1.0, %v2160_v43 }
 0x581   :  { %v1305_v54 = vadd.f32 1.0, %v2162_v37  ;;  %v2164_v55 = vpop.eup %2163 }
 0x582   :  { %2167 = vrcp.f32 %v1299_v48  ;;  %v2166_v47 = vpop.eup %2165  ;;  %v1312_v9 = vadd.f32 1.0, %v2164_v55 }
 0x583   :  { %2169 = vrcp.f32 %v1305_v54 }
 0x584   :  { %2171 = vrcp.f32 %v1312_v9 }
 0x58c   :  { %v2168_v6 = vpop.eup %2167 }
 0x58d   :  { %v2170_v7 = vpop.eup %2169  ;;  %v1315_v8 = vmul.f32 %v2168_v6, %v2766_v12  ;;  %v2857_v12 = vld [vmem:[#allocation5 + $0x24] ss:$16 sps:$4 sm:$0xff]  }
 0x58e   :  { %v1316_v10 = vmul.f32 %v2170_v7, %v2166_v47  ;;  %v2172_v13 = vpop.eup %2171 }
 0x590   :  { %v2848_v11 = vadd.f32 %v1316_v10, %v1315_v8 }
 0x592   :  { %2173 = vtanh.f32 %v2848_v11 }
 0x59c   :  { %v2174_v14 = vpop.eup %2173 }
 0x59d   :  { %v1319_v15 = vmul.f32 %v2174_v14, %v2172_v13 }
 0x59f   :  { %v1322_v51 = vpack.c.bf16 %v1319_v15, %v1319_v15 }
 0x5a1   :  { %1356 = vmatmul.mubr.bf16.vlgmr.msra.gmra.mrb[40].mxu0 %v1322_v51  ;;  %1397 = vmatmul.mubr.bf16.vlgmr.msra.gmra.mrb[40].mxu1 %v1322_v51 }
 0x5a2   :  { %1409 = vmatpush1.bf16.msra.mxu0 %v2851_v42  ;;  %1450 = vmatpush1.bf16.msra.mxu1 %v2854_v16 }
 0x5a3   :  { %1410 = vmatprep.subr.bf16.mxu0 %v2857_v12  ;;  %1451 = vmatprep.subr.bf16.mxu1 %v2860_v17 }
 0x5a4   :  { %1440 = vmatprep.mubr.bf16.mxu0 %v3053_v49  ;;  %1481 = vmatprep.mubr.bf16.mxu1 %v3053_v49 }
 0x5a6   :  { %1411 = vmatpush1.bf16.msra.mxu0 %v2865_v18  ;;  %1452 = vmatpush1.bf16.msra.mxu1 %v2868_v19 }
 0x5a7   :  { %1521 = vmatprep.subr.bf16.mxu0 %v2777_v50  ;;  %1562 = vmatprep.subr.bf16.mxu1 %v2780_v35 }
 0x5a9   :  { %2009 = vmatmul.mubr.msk.bf16.vlgmr.msra.gmra.mrb[44].mxu0 %vm414_vm0, %v1321_v20  ;;  %2010 = vmatmul.mubr.msk.bf16.vlgmr.msra.gmra.mrb[44].mxu1 %vm414_vm0, %v1321_v20 }
 0x5aa   :  { %1522 = vmatpush1.bf16.msra.mxu0 %v2785_v36  ;;  %1563 = vmatpush1.bf16.msra.mxu1 %v2788_v38 }
 0x5ab   :  { %1523 = vmatprep.subr.bf16.mxu0 %v2791_v39  ;;  %1564 = vmatprep.subr.bf16.mxu1 %v2794_v40 }
 0x5ac   :  { %1553 = vmatprep.mubr.bf16.mxu0 %v3053_v49  ;;  %1594 = vmatprep.mubr.bf16.mxu1 %v3053_v49 }
 0x5ae   :  { %1524 = vmatpush1.bf16.msra.mxu0 %v2799_v41  ;;  %1565 = vmatpush1.bf16.msra.mxu1 %v2802_v0 }
 0x5af   :  { %1525 = vmatprep.subr.bf16.mxu0 %v2805_v34  ;;  %1566 = vmatprep.subr.bf16.mxu1 %v2808_v59 }
 0x5b2   :  { %1526 = vmatpush1.bf16.msra.mxu0 %v2811_v60  ;;  %1567 = vmatpush1.bf16.msra.mxu1 %v2814_v45 }
 0x5b3   :  { %1527 = vmatprep.subr.bf16.mxu0 %v2817_v63  ;;  %1568 = vmatprep.subr.bf16.mxu1 %v2888_v21 }
 0x5b6   :  { %1528 = vmatpush1.bf16.msra.mxu0 %v2821_v61  ;;  %1569 = vmatpush1.bf16.msra.mxu1 %v2892_v22 }
 0x5b7   :  { %1529 = vmatprep.subr.bf16.mxu0 %v2895_v23  ;;  %1570 = vmatprep.subr.bf16.mxu1 %v2898_v24 }
 0x5ba   :  { %1530 = vmatpush1.bf16.msra.mxu0 %v2901_v25  ;;  %1571 = vmatpush1.bf16.msra.mxu1 %v2904_v26 }
 0x5bb   :  { %1531 = vmatprep.subr.bf16.mxu0 %v2907_v27  ;;  %1572 = vmatprep.subr.bf16.mxu1 %v2910_v28 }
 0x5be   :  { %1532 = vmatpush1.bf16.msra.mxu0 %v2913_v29  ;;  %1573 = vmatpush1.bf16.msra.mxu1 %v2916_v30 }
 0x5bf   :  { %1533 = vmatprep.subr.bf16.mxu0 %v2919_v32  ;;  %1574 = vmatprep.subr.bf16.mxu1 %v2922_v2 }
 0x5c2   :  { %1534 = vmatpush1.bf16.msra.mxu0 %v2925_v3  ;;  %1575 = vmatpush1.bf16.msra.mxu1 %v2928_v4 }
 0x5c3   :  { %1535 = vmatprep.subr.bf16.mxu0 %v2931_v5  ;;  %1576 = vmatprep.subr.bf16.mxu1 %v2934_v44 }
 0x5c6   :  { %1536 = vmatpush1.bf16.msra.mxu0 %v2937_v62  ;;  %1577 = vmatpush1.bf16.msra.mxu1 %v2940_v1 }
 0x5c7   :  { %1606 = vmatprep.subr.bf16.mxu0 %v2943_v46  ;;  %1647 = vmatprep.subr.bf16.mxu1 %v2946_v53 }
 0x674   :  { %v1357_v52 = vpop.f32.mrb[40].mxu0  ;;  %v1398_v31 = vpop.f32.mrb[40].mxu1 }
 0x675   :  { %v1359_v43 = vpop.f32.mrb[41].mxu0  ;;  %v1400_v37 = vpop.f32.mrb[41].mxu1 }
 0x676   :  { %v1361_v48 = vpop.f32.mrb[42].mxu0  ;;  %v1402_v54 = vpop.f32.mrb[42].mxu1 }
 0x677   :  { %v1362_v55 = vpop.f32.mrb[43].mxu0  ;;  %v1403_v47 = vpop.f32.mrb[43].mxu1 }
 0x67c   :  { %v1442_v6 = vpop.f32.mrb[44].mxu0  ;;  %v1483_v7 = vpop.f32.mrb[44].mxu1 }
 0x67d   :  { %v1443_v8 = vadd.f32 %v1442_v6, %v1357_v52  ;;  %v1484_v9 = vadd.f32 %v1483_v7, %v1398_v31  ;;  %v1444_v10 = vpop.f32.mrb[45].mxu0  ;;  %v1485_v13 = vpop.f32.mrb[45].mxu1 }
 0x67e   :  { %v1445_v14 = vadd.f32 %v1444_v10, %v1359_v43  ;;  %v1486_v15 = vadd.f32 %v1485_v13, %v1400_v37  ;;  %v1446_v51 = vpop.f32.mrb[46].mxu0  ;;  %v1487_v20 = vpop.f32.mrb[46].mxu1 }
 0x67f   :  { %v1490_v53 = vadd.f32 %v1443_v8, %v2592_v56  ;;  %v1447_v46 = vpop.f32.mrb[47].mxu0  ;;  %v1488_v1 = vpop.f32.mrb[47].mxu1  ;;  %v1492_v31 = vadd.f32 %v1484_v9, %v2601_v57 }
 0x680   :  { %v1491_v62 = vadd.f32 %v1445_v14, %v2594_v58  ;;  %v1493_v55 = vadd.f32 %v1486_v15, %v2598_v33 }
 0x681   :  { %v2011_v48 = vmul.f32 -1.442695, %v1490_v53 }
 0x682   :  { %v2012_v54 = vmul.f32 -1.442695, %v1491_v62  ;;  %v2013_v52 = vmul.f32 -1.442695, %v1493_v55 }
 0x683   :  { %2175 = vpow2.f32 %v2011_v48 }
 0x684   :  { %2177 = vpow2.f32 %v2012_v54 }
 0x685   :  { %2179 = vpow2.f32 %v2013_v52 }
 0x686   :  { %2181 = vtanh.f32 %v1492_v31 }
 0x68d   :  { %v2176_v47 = vpop.eup %2175 }
 0x68e   :  { %v2178_v43 = vpop.eup %2177  ;;  %v1497_v37 = vadd.f32 1.0, %v2176_v47 }
 0x68f   :  { %v1503_v6 = vadd.f32 1.0, %v2178_v43  ;;  %v2180_v1 = vpop.eup %2179 }
 0x690   :  { %2183 = vrcp.f32 %v1497_v37  ;;  %v2182_v46 = vpop.eup %2181  ;;  %v1510_v8 = vadd.f32 1.0, %v2180_v1 }
 0x691   :  { %2185 = vrcp.f32 %v1503_v6 }
 0x692   :  { %2187 = vrcp.f32 %v1510_v8 }
 0x69a   :  { %v2184_v7 = vpop.eup %2183 }
 0x69b   :  { %v2186_v53 = vpop.eup %2185  ;;  %v1513_v62 = vmul.f32 %v2184_v7, %v2848_v11  ;;  %v1519_v11 = vld [vmem:[#allocation3 + $0x18] sm:$0xf] }
 0x69c   :  { %v1514_v10 = vmul.f32 %v2186_v53, %v2182_v46  ;;  %v2188_v9 = vpop.eup %2187 }
 0x69e   :  { %v2954_v13 = vadd.f32 %v1514_v10, %v1513_v62 }
 0x6a0   :  { %2189 = vtanh.f32 %v2954_v13 }
 0x6aa   :  { %v2190_v14 = vpop.eup %2189 }
 0x6ab   :  { %v1517_v15 = vmul.f32 %v2190_v14, %v2188_v9 }
 0x6ad   :  { %v1520_v51 = vpack.c.bf16 %v1517_v15, %v1517_v15 }
 0x6af   :  { %1554 = vmatmul.mubr.bf16.vlgmr.msra.gmra.mrb[48].mxu0 %v1520_v51  ;;  %1595 = vmatmul.mubr.bf16.vlgmr.msra.gmra.mrb[48].mxu1 %v1520_v51 }
 0x6b0   :  { %1607 = vmatpush1.bf16.msra.mxu0 %v2851_v42  ;;  %1648 = vmatpush1.bf16.msra.mxu1 %v2854_v16 }
 0x6b1   :  { %1608 = vmatprep.subr.bf16.mxu0 %v2857_v12  ;;  %1649 = vmatprep.subr.bf16.mxu1 %v2860_v17 }
 0x6b2   :  { %1638 = vmatprep.mubr.bf16.mxu0 %v3053_v49  ;;  %1679 = vmatprep.mubr.bf16.mxu1 %v3053_v49 }
 0x6b4   :  { %1609 = vmatpush1.bf16.msra.mxu0 %v2865_v18  ;;  %1650 = vmatpush1.bf16.msra.mxu1 %v2868_v19 }
 0x6b5   :  { %1719 = vmatprep.subr.bf16.mxu0 %v2777_v50  ;;  %1760 = vmatprep.subr.bf16.mxu1 %v2780_v35  ;;  %v3068_v50 = vld [vmem:[#allocation10_spill] sm:$0xff]  ;;  %v3069_v35 = vld [vmem:[#allocation12_spill] sm:$0xff] }
 0x6b7   :  { %2014 = vmatmul.mubr.msk.bf16.vlgmr.msra.gmra.mrb[52].mxu0 %vm414_vm0, %v1519_v11  ;;  %2015 = vmatmul.mubr.msk.bf16.vlgmr.msra.gmra.mrb[52].mxu1 %vm414_vm0, %v1519_v11 }
 0x6b8   :  { %1720 = vmatpush1.bf16.msra.mxu0 %v2785_v36  ;;  %1761 = vmatpush1.bf16.msra.mxu1 %v2788_v38  ;;  %v3070_v36 = vld [vmem:[#allocation11_spill] sm:$0xff]  ;;  %v3071_v38 = vld [vmem:[#allocation13_spill] sm:$0xff] }
 0x6b9   :  { %1721 = vmatprep.subr.bf16.mxu0 %v2791_v39  ;;  %1762 = vmatprep.subr.bf16.mxu1 %v2794_v40 }
 0x6ba   :  { %1751 = vmatprep.mubr.bf16.mxu0 %v3053_v49  ;;  %1792 = vmatprep.mubr.bf16.mxu1 %v3053_v49 }
 0x6bc   :  { %1722 = vmatpush1.bf16.msra.mxu0 %v2799_v41  ;;  %1763 = vmatpush1.bf16.msra.mxu1 %v2802_v0 }
 0x6bd   :  { %1723 = vmatprep.subr.bf16.mxu0 %v2805_v34  ;;  %1764 = vmatprep.subr.bf16.mxu1 %v2808_v59 }
 0x6c0   :  { %1724 = vmatpush1.bf16.msra.mxu0 %v2811_v60  ;;  %1765 = vmatpush1.bf16.msra.mxu1 %v2814_v45 }
 0x6c1   :  { %1725 = vmatprep.subr.bf16.mxu0 %v2817_v63  ;;  %1766 = vmatprep.subr.bf16.mxu1 %v2888_v21 }
 0x6c4   :  { %1726 = vmatpush1.bf16.msra.mxu0 %v2821_v61  ;;  %1767 = vmatpush1.bf16.msra.mxu1 %v2892_v22 }
 0x6c5   :  { %1727 = vmatprep.subr.bf16.mxu0 %v2895_v23  ;;  %1768 = vmatprep.subr.bf16.mxu1 %v2898_v24 }
 0x6c8   :  { %1728 = vmatpush1.bf16.msra.mxu0 %v2901_v25  ;;  %1769 = vmatpush1.bf16.msra.mxu1 %v2904_v26 }
 0x6c9   :  { %1729 = vmatprep.subr.bf16.mxu0 %v2907_v27  ;;  %1770 = vmatprep.subr.bf16.mxu1 %v2910_v28 }
 0x6cc   :  { %1730 = vmatpush1.bf16.msra.mxu0 %v2913_v29  ;;  %1771 = vmatpush1.bf16.msra.mxu1 %v2916_v30 }
 0x6cd   :  { %1731 = vmatprep.subr.bf16.mxu0 %v2919_v32  ;;  %1772 = vmatprep.subr.bf16.mxu1 %v2922_v2 }
 0x6d0   :  { %1732 = vmatpush1.bf16.msra.mxu0 %v2925_v3  ;;  %1773 = vmatpush1.bf16.msra.mxu1 %v2928_v4 }
 0x6d1   :  { %1733 = vmatprep.subr.bf16.mxu0 %v2931_v5  ;;  %1774 = vmatprep.subr.bf16.mxu1 %v2934_v44 }
 0x6d4   :  { %1734 = vmatpush1.bf16.msra.mxu0 %v3068_v50  ;;  %1775 = vmatpush1.bf16.msra.mxu1 %v3069_v35 }
 0x6d5   :  { %1804 = vmatprep.subr.bf16.mxu0 %v3070_v36  ;;  %1845 = vmatprep.subr.bf16.mxu1 %v3071_v38 }
 0x782   :  { %v1555_v39 = vpop.f32.mrb[48].mxu0  ;;  %v1596_v40 = vpop.f32.mrb[48].mxu1 }
 0x783   :  { %v1557_v41 = vpop.f32.mrb[49].mxu0  ;;  %v1598_v0 = vpop.f32.mrb[49].mxu1 }
 0x784   :  { %v1559_v34 = vpop.f32.mrb[50].mxu0  ;;  %v1600_v59 = vpop.f32.mrb[50].mxu1 }
 0x785   :  { %v1560_v60 = vpop.f32.mrb[51].mxu0  ;;  %v1601_v45 = vpop.f32.mrb[51].mxu1 }
 0x78a   :  { %v1640_v63 = vpop.f32.mrb[52].mxu0  ;;  %v1681_v61 = vpop.f32.mrb[52].mxu1 }
 0x78b   :  { %v1641_v21 = vadd.f32 %v1640_v63, %v1555_v39  ;;  %v1682_v22 = vadd.f32 %v1681_v61, %v1596_v40  ;;  %v1642_v23 = vpop.f32.mrb[53].mxu0  ;;  %v1683_v24 = vpop.f32.mrb[53].mxu1 }
 0x78c   :  { %v1643_v25 = vadd.f32 %v1642_v23, %v1557_v41  ;;  %v1684_v26 = vadd.f32 %v1683_v24, %v1598_v0  ;;  %v1644_v27 = vpop.f32.mrb[54].mxu0  ;;  %v1685_v28 = vpop.f32.mrb[54].mxu1 }
 0x78d   :  { %v1688_v29 = vadd.f32 %v1641_v21, %v2592_v56  ;;  %v1645_v30 = vpop.f32.mrb[55].mxu0  ;;  %v1686_v32 = vpop.f32.mrb[55].mxu1  ;;  %v1690_v20 = vadd.f32 %v1682_v22, %v2601_v57 }
 0x78e   :  { %v1689_v2 = vadd.f32 %v1643_v25, %v2594_v58  ;;  %v1691_v5 = vadd.f32 %v1684_v26, %v2598_v33 }
 0x78f   :  { %v2016_v3 = vmul.f32 -1.442695, %v1688_v29 }
 0x790   :  { %v2017_v4 = vmul.f32 -1.442695, %v1689_v2  ;;  %v2018_v44 = vmul.f32 -1.442695, %v1691_v5  ;;  %v2024_v2 = vld [vmem:[%s3032_s4] ss:$0 sm:$0xff] }
 0x791   :  { %2191 = vpow2.f32 %v2016_v3  ;;  %v2025_v5 = vld [vmem:[#allocation2] ss:$0 sm:$0xff] }
 0x792   :  { %2193 = vpow2.f32 %v2017_v4 }
 0x793   :  { %2195 = vpow2.f32 %v2018_v44 }
 0x794   :  { %2197 = vtanh.f32 %v1690_v20 }
 0x79b   :  { %v2192_v48 = vpop.eup %2191 }
 0x79c   :  { %v2194_v54 = vpop.eup %2193  ;;  %v1695_v55 = vadd.f32 1.0, %v2192_v48 }
 0x79d   :  { %v1701_v52 = vadd.f32 1.0, %v2194_v54  ;;  %v2196_v31 = vpop.eup %2195 }
 0x79e   :  { %2199 = vrcp.f32 %v1695_v55  ;;  %v2198_v47 = vpop.eup %2197  ;;  %v1708_v1 = vadd.f32 1.0, %v2196_v31 }
 0x79f   :  { %2201 = vrcp.f32 %v1701_v52 }
 0x7a0   :  { %2203 = vrcp.f32 %v1708_v1 }
 0x7a8   :  { %v2200_v43 = vpop.eup %2199 }
 0x7a9   :  { %v2202_v37 = vpop.eup %2201  ;;  %v1711_v6 = vmul.f32 %v2200_v43, %v2954_v13  ;;  %v1717_v13 = vld [vmem:[#allocation3 + $0x1c] sm:$0xf] }
 0x7aa   :  { %v1712_v46 = vmul.f32 %v2202_v37, %v2198_v47  ;;  %v2204_v53 = vpop.eup %2203 }
 0x7ac   :  { %v1713_v7 = vadd.f32 %v1712_v46, %v1711_v6 }
 0x7ae   :  { %2205 = vtanh.f32 %v1713_v7 }
 0x7b8   :  { %v2206_v62 = vpop.eup %2205 }
 0x7b9   :  { %v1715_v8 = vmul.f32 %v2206_v62, %v2204_v53 }
 0x7bb   :  { %v1718_v10 = vpack.c.bf16 %v1715_v8, %v1715_v8 }
 0x7bd   :  { %1752 = vmatmul.mubr.bf16.vlgmr.msra.gmra.mrb[56].mxu0 %v1718_v10  ;;  %1793 = vmatmul.mubr.bf16.vlgmr.msra.gmra.mrb[56].mxu1 %v1718_v10 }
 0x7be   :  { %1805 = vmatpush1.bf16.msra.mxu0 %v2851_v42  ;;  %1846 = vmatpush1.bf16.msra.mxu1 %v2854_v16 }
 0x7bf   :  { %1806 = vmatprep.subr.bf16.mxu0 %v2857_v12  ;;  %1847 = vmatprep.subr.bf16.mxu1 %v2860_v17 }
 0x7c0   :  { %1836 = vmatprep.mubr.bf16.mxu0 %v3053_v49  ;;  %1877 = vmatprep.mubr.bf16.mxu1 %v3053_v49 }
 0x7c2   :  { %1807 = vmatpush1.bf16.msra.mxu0 %v2865_v18  ;;  %1848 = vmatpush1.bf16.msra.mxu1 %v2868_v19 }
 0x7c5   :  { %2019 = vmatmul.mubr.msk.bf16.vlgmr.msra.gmra.mrb[60].mxu0 %vm414_vm0, %v1717_v13  ;;  %2020 = vmatmul.mubr.msk.bf16.vlgmr.msra.gmra.mrb[60].mxu1 %vm414_vm0, %v1717_v13 }
 0x890   :  { %v1753_v42 = vpop.f32.mrb[56].mxu0  ;;  %v1794_v9 = vpop.f32.mrb[56].mxu1 }
 0x891   :  { %v1755_v16 = vpop.f32.mrb[57].mxu0  ;;  %v1796_v14 = vpop.f32.mrb[57].mxu1 }
 0x892   :  { %v1757_v12 = vpop.f32.mrb[58].mxu0  ;;  %v1798_v15 = vpop.f32.mrb[58].mxu1 }
 0x893   :  { %v1758_v17 = vpop.f32.mrb[59].mxu0  ;;  %v1799_v51 = vpop.f32.mrb[59].mxu1 }
 0x898   :  { %v1838_v11 = vpop.f32.mrb[60].mxu0  ;;  %v1879_v50 = vpop.f32.mrb[60].mxu1 }
 0x899   :  { %v1839_v49 = vadd.f32 %v1838_v11, %v1753_v42  ;;  %v1880_v35 = vadd.f32 %v1879_v50, %v1794_v9  ;;  %v1840_v18 = vpop.f32.mrb[61].mxu0  ;;  %v1881_v36 = vpop.f32.mrb[61].mxu1 }
 0x89a   :  { %v1841_v19 = vadd.f32 %v1840_v18, %v1755_v16  ;;  %v1882_v38 = vadd.f32 %v1881_v36, %v1796_v14  ;;  %v1842_v39 = vpop.f32.mrb[62].mxu0  ;;  %v1883_v40 = vpop.f32.mrb[62].mxu1 }
 0x89b   :  { %v1886_v41 = vadd.f32 %v1839_v49, %v2592_v56  ;;  %v1843_v0 = vpop.f32.mrb[63].mxu0  ;;  %v1884_v34 = vpop.f32.mrb[63].mxu1  ;;  %v1888_v21 = vadd.f32 %v1880_v35, %v2601_v57 }
 0x89c   :  { %v1887_v59 = vadd.f32 %v1841_v19, %v2594_v58  ;;  %v1889_v63 = vadd.f32 %v1882_v38, %v2598_v33 }
 0x89d   :  { %v2021_v60 = vmul.f32 -1.442695, %v1886_v41 }
 0x89e   :  { %v2022_v45 = vmul.f32 -1.442695, %v1887_v59  ;;  %v2023_v61 = vmul.f32 -1.442695, %v1889_v63 }
 0x89f   :  { %2207 = vpow2.f32 %v2021_v60 }
 0x8a0   :  { %2209 = vpow2.f32 %v2022_v45 }
 0x8a1   :  { %2211 = vpow2.f32 %v2023_v61 }
 0x8a2   :  { %2213 = vtanh.f32 %v1888_v21 }
 0x8a9   :  { %v2208_v22 = vpop.eup %2207 }
 0x8aa   :  { %v2210_v23 = vpop.eup %2209  ;;  %v1893_v24 = vadd.f32 1.0, %v2208_v22 }
 0x8ab   :  { %v1899_v25 = vadd.f32 1.0, %v2210_v23  ;;  %v2212_v56 = vpop.eup %2211 }
 0x8ac   :  { %2215 = vrcp.f32 %v1893_v24  ;;  %v2214_v26 = vpop.eup %2213  ;;  %v1906_v28 = vadd.f32 1.0, %v2212_v56 }
 0x8ad   :  { %2217 = vrcp.f32 %v1899_v25 }
 0x8ae   :  { %2219 = vrcp.f32 %v1906_v28 }
 0x8b6   :  { %v2216_v58 = vpop.eup %2215 }
 0x8b7   :  { %v2218_v27 = vpop.eup %2217  ;;  %v1909_v29 = vmul.f32 %v2216_v58, %v1713_v7 }
 0x8b8   :  { %v1910_v30 = vmul.f32 %v2218_v27, %v2214_v26  ;;  %v2220_v33 = vpop.eup %2219 }
 0x8ba   :  { %v1911_v32 = vadd.f32 %v1910_v30, %v1909_v29 }
 0x8bc   :  { %2221 = vtanh.f32 %v1911_v32 }
 0x8c6   :  { %v2222_v57 = vpop.eup %2221 }
 0x8c7   :  { %v1913_v3 = vmul.f32 %v2222_v57, %v2220_v33 }
 0x8c9   :  { %v1920_v4 = vmul.f32 %v2024_v2, %v1913_v3 }
 0x8cb   :  { %1921 = vadd.xlane.f32.xlu0 %v1920_v4 }
 0x958   :  { %v1922_v44 = vpop.xlane.xlu0 %1921 }
 0x959   :  { %v1929_v20 = vadd.f32 %v2025_v5, %v1922_v44 }
 0x95b   :  { %v2026_v48 = vmul.f32 -1.442695, %v1929_v20 }
 0x95d   :  { %2223 = vpow2.f32 %v2026_v48 }
 0x967   :  { %v2224_v54 = vpop.eup %2223 }
 0x968   :  { %v1933_v55 = vadd.f32 1.0, %v2224_v54 }
 0x96a   :  { %2225 = vrcp.f32 %v1933_v55 }
 0x974   :  { %v2226_v52 = vpop.eup %2225 }
 0x975   :  { %1937 = vst.msk [vmem:[%s3034_s6] sm:$0xff] %vm1936_vm1, %v2226_v52 }
 0x976   :  { %1942 = vsyncpa [#allocation4], 1 }
 0x977   :  { %1943 = vsyncpa [#allocation6], 1 }

</bundles_post_ra>
